<compile_context>
chip_gen: v6e
topology: v6e:2x2x1
jax: 0.10.0
libtpu: 0.0.40
codegen_flags: <defaults>
</compile_context>

<pallas_src>
import math

import jax
import jax.numpy as jnp
from jax.experimental import pallas as pl
from jax.experimental.pallas import tpu as pltpu


# ------------------------------ fused kernel --------------------------------

def _fused_transformer_kernel(
    # inputs
    src_ref, pe_ref, proj_w_ref, proj_b_ref,
    wq_ref, wk_ref, wv_ref, bq_ref, bk_ref, bv_ref,
    wo_ref, bo_ref, ln1_g_ref, ln1_b_ref,
    ff1_w_ref, ff1_b_ref, ff2_w_ref, ff2_b_ref,
    ln2_g_ref, ln2_b_ref, out_w_ref, out_b_ref,
    # outputs
    o_ref,
    # scratch
    x_scratch,
):
    eps = 1e-5
    l = pl.program_id(1)
    n_layers = pl.num_programs(1)
    H, D, Dh = wq_ref.shape
    S = x_scratch.shape[0]
    scale = 1.0 / math.sqrt(Dh)

    def layer_norm(h, g, b):
        # torch LayerNorm semantics: biased variance, eps inside rsqrt
        mean = jnp.mean(h, axis=-1, keepdims=True)
        var = jnp.mean(jnp.square(h - mean), axis=-1, keepdims=True)
        return (h - mean) * jax.lax.rsqrt(var + eps) * g + b

    # ---- prologue (first layer step only): input proj + positional enc ----
    @pl.when(l == 0)
    def _():
        src = src_ref[...].astype(jnp.bfloat16)                   # (S, in_dim)
        x0 = jnp.dot(src, proj_w_ref[...],
                     preferred_element_type=jnp.float32)          # (S, D) f32
        x_scratch[...] = x0 + proj_b_ref[...] + pe_ref[...]

    # ---- one post-norm encoder layer (relu FF, dropout = identity/eval) ----
    x = x_scratch[...]                                            # (S, D) f32
    x_bf = x.astype(jnp.bfloat16)

    # Self-attention: per-head weight slabs, all math stays lane-dense on D.
    attn_out = bo_ref[...]                                        # (1, D) f32
    for h in range(H):
        qh = jnp.dot(x_bf, wq_ref[h],
                     preferred_element_type=jnp.float32) + bq_ref[h]  # (S, Dh)
        kh = jnp.dot(x_bf, wk_ref[h],
                     preferred_element_type=jnp.float32) + bk_ref[h]
        vh = jnp.dot(x_bf, wv_ref[h],
                     preferred_element_type=jnp.float32) + bv_ref[h]
        s = jax.lax.dot_general(
            qh.astype(jnp.bfloat16), kh.astype(jnp.bfloat16),
            dimension_numbers=(((1,), (1,)), ((), ())),
            preferred_element_type=jnp.float32) * scale           # (S, S) f32
        s = s - jnp.max(s, axis=-1, keepdims=True)
        p = jnp.exp(s)
        p = p * pl.reciprocal(jnp.sum(p, axis=-1, keepdims=True), approx=True)
        oh = jnp.dot(p.astype(jnp.bfloat16), vh.astype(jnp.bfloat16),
                     preferred_element_type=jnp.float32)          # (S, Dh)
        # out-projection accumulated per head: concat_h(oh) @ Wo == sum_h oh@Wo_h
        attn_out = attn_out + jnp.dot(oh.astype(jnp.bfloat16), wo_ref[h],
                                      preferred_element_type=jnp.float32)

    h1 = layer_norm(x + attn_out, ln1_g_ref[...], ln1_b_ref[...])  # (S, D)

    # Feed-forward: hidden (S, dff) never leaves VMEM.
    hid = jnp.dot(h1.astype(jnp.bfloat16), ff1_w_ref[...],
                  preferred_element_type=jnp.float32) + ff1_b_ref[...]
    hid = jnp.maximum(hid, 0.0)
    ff = jnp.dot(hid.astype(jnp.bfloat16), ff2_w_ref[...],
                 preferred_element_type=jnp.float32) + ff2_b_ref[...]
    x_new = layer_norm(h1 + ff, ln2_g_ref[...], ln2_b_ref[...])
    x_scratch[...] = x_new

    # ---- epilogue (last layer step only): output head on last token ----
    @pl.when(l == n_layers - 1)
    def _():
        last = x_new[S - 1:S, :].astype(jnp.bfloat16)             # (1, D)
        y = jnp.dot(last, out_w_ref[...],
                    preferred_element_type=jnp.float32) + out_b_ref[...]
        o_ref[...] = y                                            # (1, out_dim)


# ------------------------------ host wrapper ---------------------------------

def transformer_predictor_forward(src, params):
    B, S, input_dim = src.shape
    L, H, D, Dh = params["wq"].shape
    dff = params["ff1_w"].shape[2]
    out_dim = params["out_w"].shape[1]

    def cidx2(b, l): return (0, 0)
    def bidx3(b, l): return (b, 0, 0)
    def lidx3(b, l): return (l, 0, 0)
    def lidx4(b, l): return (l, 0, 0, 0)

    in_specs = [
        pl.BlockSpec((None, S, input_dim), bidx3),   # src
        pl.BlockSpec((S, D), cidx2),                 # pe
        pl.BlockSpec((input_dim, D), cidx2),         # proj_w
        pl.BlockSpec((1, D), cidx2),                 # proj_b
        pl.BlockSpec((None, H, D, Dh), lidx4),       # wq
        pl.BlockSpec((None, H, D, Dh), lidx4),       # wk
        pl.BlockSpec((None, H, D, Dh), lidx4),       # wv
        pl.BlockSpec((None, H, 1, Dh), lidx4),       # bq
        pl.BlockSpec((None, H, 1, Dh), lidx4),       # bk
        pl.BlockSpec((None, H, 1, Dh), lidx4),       # bv
        pl.BlockSpec((None, H, Dh, D), lidx4),       # wo
        pl.BlockSpec((None, 1, D), lidx3),           # bo
        pl.BlockSpec((None, 1, D), lidx3),           # ln1_g
        pl.BlockSpec((None, 1, D), lidx3),           # ln1_b
        pl.BlockSpec((None, D, dff), lidx3),         # ff1_w
        pl.BlockSpec((None, 1, dff), lidx3),         # ff1_b
        pl.BlockSpec((None, dff, D), lidx3),         # ff2_w
        pl.BlockSpec((None, 1, D), lidx3),           # ff2_b
        pl.BlockSpec((None, 1, D), lidx3),           # ln2_g
        pl.BlockSpec((None, 1, D), lidx3),           # ln2_b
        pl.BlockSpec((D, out_dim), cidx2),           # out_w
        pl.BlockSpec((1, out_dim), cidx2),           # out_b
    ]

    out = pl.pallas_call(
        _fused_transformer_kernel,
        out_shape=jax.ShapeDtypeStruct((B, 1, out_dim), jnp.float32),
        grid=(B, L),
        in_specs=in_specs,
        out_specs=pl.BlockSpec((None, 1, out_dim), bidx3),
        scratch_shapes=[pltpu.VMEM((S, D), jnp.float32)],
        compiler_params=pltpu.CompilerParams(
            dimension_semantics=("parallel", "arbitrary")),
    )(src, params["pe"], params["proj_w"], params["proj_b"],
      params["wq"], params["wk"], params["wv"],
      params["bq"], params["bk"], params["bv"],
      params["wo"], params["bo"], params["ln1_g"], params["ln1_b"],
      params["ff1_w"], params["ff1_b"], params["ff2_w"], params["ff2_b"],
      params["ln2_g"], params["ln2_b"], params["out_w"], params["out_b"])
    return out.reshape(B, out_dim)


# ------------------------------ params / PE ----------------------------------

def make_positional_encoding(seq_len, d_model):
    # Matches PositionalEncoding buffer pe[:seq_len, 0, :]
    position = jnp.arange(seq_len, dtype=jnp.float32)[:, None]
    div_term = jnp.exp(jnp.arange(0, d_model, 2, dtype=jnp.float32)
                       * (-math.log(10000.0) / d_model))
    angles = position * div_term
    pe = jnp.zeros((seq_len, d_model), jnp.float32)
    pe = pe.at[:, 0::2].set(jnp.sin(angles))
    pe = pe.at[:, 1::2].set(jnp.cos(angles))
    return pe


def init_params(key, input_dim, d_model, nhead, n_layers, dff, output_dim,
                seq_len):
    Dh = d_model // nhead

    def w(k, shape, scale=0.05, dtype=jnp.bfloat16):
        return (jax.random.normal(k, shape, jnp.float32) * scale).astype(dtype)

    keys = jax.random.split(key, 4 + n_layers)
    params = {
        "proj_w": w(keys[0], (input_dim, d_model)),
        "proj_b": w(keys[1], (1, d_model), dtype=jnp.float32),
        "pe": make_positional_encoding(seq_len, d_model),
        "out_w": w(keys[2], (d_model, output_dim)),
        "out_b": w(keys[3], (1, output_dim), dtype=jnp.float32),
    }

    names = ["wq", "wk", "wv", "bq", "bk", "bv", "wo", "bo",
             "ln1_g", "ln1_b", "ff1_w", "ff1_b", "ff2_w", "ff2_b",
             "ln2_g", "ln2_b"]
    layers = {n: [] for n in names}
    for i in range(n_layers):
        lk = jax.random.split(keys[4 + i], 12)
        # attention in-projection, per-head layout: (H, D, Dh) / (H, 1, Dh)
        layers["wq"].append(w(lk[0], (nhead, d_model, Dh)))
        layers["wk"].append(w(lk[1], (nhead, d_model, Dh)))
        layers["wv"].append(w(lk[2], (nhead, d_model, Dh)))
        layers["bq"].append(w(lk[3], (nhead, 1, Dh), dtype=jnp.float32))
        layers["bk"].append(w(lk[4], (nhead, 1, Dh), dtype=jnp.float32))
        layers["bv"].append(w(lk[5], (nhead, 1, Dh), dtype=jnp.float32))
        # attention out-projection split per head: (H, Dh, D)
        layers["wo"].append(w(lk[6], (nhead, Dh, d_model)))
        layers["bo"].append(w(lk[7], (1, d_model), dtype=jnp.float32))
        layers["ln1_g"].append(jnp.ones((1, d_model), jnp.float32))
        layers["ln1_b"].append(jnp.zeros((1, d_model), jnp.float32))
        layers["ff1_w"].append(w(lk[8], (d_model, dff)))
        layers["ff1_b"].append(w(lk[9], (1, dff), dtype=jnp.float32))
        layers["ff2_w"].append(w(lk[10], (dff, d_model)))
        layers["ff2_b"].append(w(lk[11], (1, d_model), dtype=jnp.float32))
        layers["ln2_g"].append(jnp.ones((1, d_model), jnp.float32))
        layers["ln2_b"].append(jnp.zeros((1, d_model), jnp.float32))
    for name in names:
        params[name] = jnp.stack(layers[name], axis=0)
    return params


# ----------------------------------- main ------------------------------------

if __name__ == "__main__":
    B, S = 2, 8
    input_dim, d_model, nhead, n_layers, output_dim = 16, 32, 4, 2, 8
    dim_feedforward = 2048  # hardcoded in the PyTorch module

    key = jax.random.PRNGKey(0)
    k_params, k_src = jax.random.split(key)

    params = init_params(k_params, input_dim, d_model, nhead, n_layers,
                         dim_feedforward, output_dim, seq_len=S)
    src = jax.random.normal(k_src, (B, S, input_dim), jnp.float32)

    fwd = jax.jit(transformer_predictor_forward)
    out = jax.block_until_ready(fwd(src, params))

    assert out.shape == (B, output_dim)
    assert out.dtype == jnp.float32
    assert bool(jnp.all(jnp.isfinite(out)))
    print("KERNEL_OK")
</pallas_src>

<mosaic_0001>
module attributes {stable_mosaic.version = 11 : i64} {
  func.func @_fused_transformer_kernel(%arg0: i32, %arg1: i32, %arg2: memref<1x8x16xf32, #tpu.memory_space<vmem>>, %arg3: memref<8x32xf32, #tpu.memory_space<vmem>>, %arg4: memref<16x32xbf16, #tpu.memory_space<vmem>>, %arg5: memref<1x32xf32, #tpu.memory_space<vmem>>, %arg6: memref<1x4x32x8xbf16, #tpu.memory_space<vmem>>, %arg7: memref<1x4x32x8xbf16, #tpu.memory_space<vmem>>, %arg8: memref<1x4x32x8xbf16, #tpu.memory_space<vmem>>, %arg9: memref<1x4x1x8xf32, #tpu.memory_space<vmem>>, %arg10: memref<1x4x1x8xf32, #tpu.memory_space<vmem>>, %arg11: memref<1x4x1x8xf32, #tpu.memory_space<vmem>>, %arg12: memref<1x4x8x32xbf16, #tpu.memory_space<vmem>>, %arg13: memref<1x1x32xf32, #tpu.memory_space<vmem>>, %arg14: memref<1x1x32xf32, #tpu.memory_space<vmem>>, %arg15: memref<1x1x32xf32, #tpu.memory_space<vmem>>, %arg16: memref<1x32x2048xbf16, #tpu.memory_space<vmem>>, %arg17: memref<1x1x2048xf32, #tpu.memory_space<vmem>>, %arg18: memref<1x2048x32xbf16, #tpu.memory_space<vmem>>, %arg19: memref<1x1x32xf32, #tpu.memory_space<vmem>>, %arg20: memref<1x1x32xf32, #tpu.memory_space<vmem>>, %arg21: memref<1x1x32xf32, #tpu.memory_space<vmem>>, %arg22: memref<32x8xbf16, #tpu.memory_space<vmem>>, %arg23: memref<1x8xf32, #tpu.memory_space<vmem>>, %arg24: memref<1x1x8xf32, #tpu.memory_space<vmem>>, %arg25: memref<8x32xf32, #tpu.memory_space<vmem>>) attributes {dimension_semantics = [#tpu.dimension_semantics<parallel>, #tpu.dimension_semantics<arbitrary>], iteration_bounds = array<i64: 2, 2>, scalar_prefetch = 0 : i64, scratch_operands = 1 : i64, tpu.core_type = #tpu.core_type<tc>, window_params = [{transform_indices = @transform_0, window_bounds = array<i64: 1, 8, 16>}, {pipeline_mode = #tpu.pipeline_mode<synchronous>, transform_indices = @transform_1, window_bounds = array<i64: 8, 32>}, {pipeline_mode = #tpu.pipeline_mode<synchronous>, transform_indices = @transform_2, window_bounds = array<i64: 16, 32>}, {pipeline_mode = #tpu.pipeline_mode<synchronous>, transform_indices = @transform_3, window_bounds = array<i64: 1, 32>}, {transform_indices = @transform_4, window_bounds = array<i64: 1, 4, 32, 8>}, {transform_indices = @transform_5, window_bounds = array<i64: 1, 4, 32, 8>}, {transform_indices = @transform_6, window_bounds = array<i64: 1, 4, 32, 8>}, {transform_indices = @transform_7, window_bounds = array<i64: 1, 4, 1, 8>}, {transform_indices = @transform_8, window_bounds = array<i64: 1, 4, 1, 8>}, {transform_indices = @transform_9, window_bounds = array<i64: 1, 4, 1, 8>}, {transform_indices = @transform_10, window_bounds = array<i64: 1, 4, 8, 32>}, {transform_indices = @transform_11, window_bounds = array<i64: 1, 1, 32>}, {transform_indices = @transform_12, window_bounds = array<i64: 1, 1, 32>}, {transform_indices = @transform_13, window_bounds = array<i64: 1, 1, 32>}, {transform_indices = @transform_14, window_bounds = array<i64: 1, 32, 2048>}, {transform_indices = @transform_15, window_bounds = array<i64: 1, 1, 2048>}, {transform_indices = @transform_16, window_bounds = array<i64: 1, 2048, 32>}, {transform_indices = @transform_17, window_bounds = array<i64: 1, 1, 32>}, {transform_indices = @transform_18, window_bounds = array<i64: 1, 1, 32>}, {transform_indices = @transform_19, window_bounds = array<i64: 1, 1, 32>}, {pipeline_mode = #tpu.pipeline_mode<synchronous>, transform_indices = @transform_20, window_bounds = array<i64: 32, 8>}, {pipeline_mode = #tpu.pipeline_mode<synchronous>, transform_indices = @transform_21, window_bounds = array<i64: 1, 8>}, {transform_indices = @transform_22, window_bounds = array<i64: 1, 1, 8>}]} {
    %c0_i32 = arith.constant 0 : i32
    %0 = arith.cmpi eq, %arg1, %c0_i32 : i32
    %1 = arith.extui %0 : i1 to i32
    %c0_i32_0 = arith.constant 0 : i32
    %2 = arith.cmpi ne, %1, %c0_i32_0 : i32
    scf.if %2 {
      %c0_189 = arith.constant 0 : index
      %c0_190 = arith.constant 0 : index
      %c0_191 = arith.constant 0 : index
      %260 = vector.load %arg2[%c0_189, %c0_190, %c0_191] : memref<1x8x16xf32, #tpu.memory_space<vmem>>, vector<1x8x16xf32>
      %261 = vector.shape_cast %260 : vector<1x8x16xf32> to vector<8x16xf32>
      %262 = arith.truncf %261 : vector<8x16xf32> to vector<8x16xbf16>
      %c0_192 = arith.constant 0 : index
      %c0_193 = arith.constant 0 : index
      %263 = vector.load %arg4[%c0_192, %c0_193] : memref<16x32xbf16, #tpu.memory_space<vmem>>, vector<16x32xbf16>
      %cst_194 = arith.constant dense<0.000000e+00> : vector<8x32xf32>
      %264 = tpu.matmul %262, %263, %cst_194 {dimension_numbers = #tpu.dot_dimension_numbers<[1], [0], [0], [1], [0, 0, 1, 1], [], []>} : vector<8x16xbf16>, vector<16x32xbf16>, vector<8x32xf32> -> vector<8x32xf32>
      %c0_195 = arith.constant 0 : index
      %c0_196 = arith.constant 0 : index
      %265 = vector.load %arg5[%c0_195, %c0_196] : memref<1x32xf32, #tpu.memory_space<vmem>>, vector<1x32xf32>
      %266 = vector.broadcast %265 : vector<1x32xf32> to vector<8x32xf32>
      %267 = arith.addf %264, %266 : vector<8x32xf32>
      %c0_197 = arith.constant 0 : index
      %c0_198 = arith.constant 0 : index
      %268 = vector.load %arg3[%c0_197, %c0_198] : memref<8x32xf32, #tpu.memory_space<vmem>>, vector<8x32xf32>
      %269 = arith.addf %267, %268 : vector<8x32xf32>
      %c0_199 = arith.constant 0 : index
      %c0_200 = arith.constant 0 : index
      %270 = vector.load %arg25[%c0_199, %c0_200] : memref<8x32xf32, #tpu.memory_space<vmem>>, vector<8x32xf32>
      tpu.vector_store %arg25[%c0_199, %c0_200], %269 {strides = array<i32>} : memref<8x32xf32, #tpu.memory_space<vmem>>, vector<8x32xf32>,
    } else {
    }
    %c0 = arith.constant 0 : index
    %c0_1 = arith.constant 0 : index
    %3 = vector.load %arg25[%c0, %c0_1] : memref<8x32xf32, #tpu.memory_space<vmem>>, vector<8x32xf32>
    %4 = arith.truncf %3 : vector<8x32xf32> to vector<8x32xbf16>
    %c0_2 = arith.constant 0 : index
    %c0_3 = arith.constant 0 : index
    %c0_4 = arith.constant 0 : index
    %5 = vector.load %arg13[%c0_2, %c0_3, %c0_4] : memref<1x1x32xf32, #tpu.memory_space<vmem>>, vector<1x1x32xf32>
    %6 = vector.shape_cast %5 : vector<1x1x32xf32> to vector<1x32xf32>
    %c0_5 = arith.constant 0 : index
    %c0_6 = arith.constant 0 : index
    %c0_7 = arith.constant 0 : index
    %c0_8 = arith.constant 0 : index
    %7 = vector.load %arg6[%c0_5, %c0_6, %c0_7, %c0_8] : memref<1x4x32x8xbf16, #tpu.memory_space<vmem>>, vector<1x1x32x8xbf16>
    %8 = vector.shape_cast %7 : vector<1x1x32x8xbf16> to vector<32x8xbf16>
    %cst = arith.constant dense<0.000000e+00> : vector<8x8xf32>
    %9 = tpu.matmul %4, %8, %cst {dimension_numbers = #tpu.dot_dimension_numbers<[1], [0], [0], [1], [0, 0, 1, 1], [], []>} : vector<8x32xbf16>, vector<32x8xbf16>, vector<8x8xf32> -> vector<8x8xf32>
    %c0_9 = arith.constant 0 : index
    %c0_10 = arith.constant 0 : index
    %c0_11 = arith.constant 0 : index
    %c0_12 = arith.constant 0 : index
    %10 = vector.load %arg9[%c0_9, %c0_10, %c0_11, %c0_12] : memref<1x4x1x8xf32, #tpu.memory_space<vmem>>, vector<1x1x1x8xf32>
    %11 = vector.shape_cast %10 : vector<1x1x1x8xf32> to vector<1x8xf32>
    %12 = vector.broadcast %11 : vector<1x8xf32> to vector<8x8xf32>
    %13 = arith.addf %9, %12 : vector<8x8xf32>
    %c0_13 = arith.constant 0 : index
    %c0_14 = arith.constant 0 : index
    %c0_15 = arith.constant 0 : index
    %c0_16 = arith.constant 0 : index
    %14 = vector.load %arg7[%c0_13, %c0_14, %c0_15, %c0_16] : memref<1x4x32x8xbf16, #tpu.memory_space<vmem>>, vector<1x1x32x8xbf16>
    %15 = vector.shape_cast %14 : vector<1x1x32x8xbf16> to vector<32x8xbf16>
    %cst_17 = arith.constant dense<0.000000e+00> : vector<8x8xf32>
    %16 = tpu.matmul %4, %15, %cst_17 {dimension_numbers = #tpu.dot_dimension_numbers<[1], [0], [0], [1], [0, 0, 1, 1], [], []>} : vector<8x32xbf16>, vector<32x8xbf16>, vector<8x8xf32> -> vector<8x8xf32>
    %c0_18 = arith.constant 0 : index
    %c0_19 = arith.constant 0 : index
    %c0_20 = arith.constant 0 : index
    %c0_21 = arith.constant 0 : index
    %17 = vector.load %arg10[%c0_18, %c0_19, %c0_20, %c0_21] : memref<1x4x1x8xf32, #tpu.memory_space<vmem>>, vector<1x1x1x8xf32>
    %18 = vector.shape_cast %17 : vector<1x1x1x8xf32> to vector<1x8xf32>
    %19 = vector.broadcast %18 : vector<1x8xf32> to vector<8x8xf32>
    %20 = arith.addf %16, %19 : vector<8x8xf32>
    %c0_22 = arith.constant 0 : index
    %c0_23 = arith.constant 0 : index
    %c0_24 = arith.constant 0 : index
    %c0_25 = arith.constant 0 : index
    %21 = vector.load %arg8[%c0_22, %c0_23, %c0_24, %c0_25] : memref<1x4x32x8xbf16, #tpu.memory_space<vmem>>, vector<1x1x32x8xbf16>
    %22 = vector.shape_cast %21 : vector<1x1x32x8xbf16> to vector<32x8xbf16>
    %cst_26 = arith.constant dense<0.000000e+00> : vector<8x8xf32>
    %23 = tpu.matmul %4, %22, %cst_26 {dimension_numbers = #tpu.dot_dimension_numbers<[1], [0], [0], [1], [0, 0, 1, 1], [], []>} : vector<8x32xbf16>, vector<32x8xbf16>, vector<8x8xf32> -> vector<8x8xf32>
    %c0_27 = arith.constant 0 : index
    %c0_28 = arith.constant 0 : index
    %c0_29 = arith.constant 0 : index
    %c0_30 = arith.constant 0 : index
    %24 = vector.load %arg11[%c0_27, %c0_28, %c0_29, %c0_30] : memref<1x4x1x8xf32, #tpu.memory_space<vmem>>, vector<1x1x1x8xf32>
    %25 = vector.shape_cast %24 : vector<1x1x1x8xf32> to vector<1x8xf32>
    %26 = vector.broadcast %25 : vector<1x8xf32> to vector<8x8xf32>
    %27 = arith.addf %23, %26 : vector<8x8xf32>
    %28 = arith.truncf %13 : vector<8x8xf32> to vector<8x8xbf16>
    %29 = arith.truncf %20 : vector<8x8xf32> to vector<8x8xbf16>
    %cst_31 = arith.constant dense<0.000000e+00> : vector<8x8xf32>
    %30 = tpu.matmul %28, %29, %cst_31 {dimension_numbers = #tpu.dot_dimension_numbers<[1], [1], [0], [0], [0, 0, 1, 0], [], []>} : vector<8x8xbf16>, vector<8x8xbf16>, vector<8x8xf32> -> vector<8x8xf32>
    %cst_32 = arith.constant 0.353553385 : f32
    %31 = vector.broadcast %cst_32 : f32 to vector<8x8xf32>
    %32 = arith.mulf %30, %31 : vector<8x8xf32>
    %cst_33 = arith.constant dense<0xFF800000> : vector<8xf32>
    %33 = vector.multi_reduction <maximumf>, %32, %cst_33 [1] : vector<8x8xf32> to vector<8xf32>
    %34 = vector.shape_cast %33 : vector<8xf32> to vector<8x1xf32>
    %35 = vector.broadcast %34 : vector<8x1xf32> to vector<8x8xf32>
    %36 = arith.subf %32, %35 : vector<8x8xf32>
    %37 = math.exp %36 : vector<8x8xf32>
    %cst_34 = arith.constant dense<0.000000e+00> : vector<8xf32>
    %38 = vector.multi_reduction <add>, %37, %cst_34 [1] : vector<8x8xf32> to vector<8xf32>
    %39 = vector.shape_cast %38 : vector<8xf32> to vector<8x1xf32>
    %40 = tpu.reciprocal %39 {approx = true} : vector<8x1xf32> -> vector<8x1xf32>
    %41 = vector.broadcast %40 : vector<8x1xf32> to vector<8x8xf32>
    %42 = arith.mulf %37, %41 : vector<8x8xf32>
    %43 = arith.truncf %42 : vector<8x8xf32> to vector<8x8xbf16>
    %44 = arith.truncf %27 : vector<8x8xf32> to vector<8x8xbf16>
    %cst_35 = arith.constant dense<0.000000e+00> : vector<8x8xf32>
    %45 = tpu.matmul %43, %44, %cst_35 {dimension_numbers = #tpu.dot_dimension_numbers<[1], [0], [0], [1], [0, 0, 1, 1], [], []>} : vector<8x8xbf16>, vector<8x8xbf16>, vector<8x8xf32> -> vector<8x8xf32>
    %46 = arith.truncf %45 : vector<8x8xf32> to vector<8x8xbf16>
    %c0_36 = arith.constant 0 : index
    %c0_37 = arith.constant 0 : index
    %c0_38 = arith.constant 0 : index
    %c0_39 = arith.constant 0 : index
    %47 = vector.load %arg12[%c0_36, %c0_37, %c0_38, %c0_39] : memref<1x4x8x32xbf16, #tpu.memory_space<vmem>>, vector<1x1x8x32xbf16>
    %48 = vector.shape_cast %47 : vector<1x1x8x32xbf16> to vector<8x32xbf16>
    %cst_40 = arith.constant dense<0.000000e+00> : vector<8x32xf32>
    %49 = tpu.matmul %46, %48, %cst_40 {dimension_numbers = #tpu.dot_dimension_numbers<[1], [0], [0], [1], [0, 0, 1, 1], [], []>} : vector<8x8xbf16>, vector<8x32xbf16>, vector<8x32xf32> -> vector<8x32xf32>
    %50 = vector.broadcast %6 : vector<1x32xf32> to vector<8x32xf32>
    %51 = arith.addf %50, %49 : vector<8x32xf32>
    %c0_41 = arith.constant 0 : index
    %c1 = arith.constant 1 : index
    %c0_42 = arith.constant 0 : index
    %c0_43 = arith.constant 0 : index
    %52 = vector.load %arg6[%c0_41, %c1, %c0_42, %c0_43] : memref<1x4x32x8xbf16, #tpu.memory_space<vmem>>, vector<1x1x32x8xbf16>
    %53 = vector.shape_cast %52 : vector<1x1x32x8xbf16> to vector<32x8xbf16>
    %cst_44 = arith.constant dense<0.000000e+00> : vector<8x8xf32>
    %54 = tpu.matmul %4, %53, %cst_44 {dimension_numbers = #tpu.dot_dimension_numbers<[1], [0], [0], [1], [0, 0, 1, 1], [], []>} : vector<8x32xbf16>, vector<32x8xbf16>, vector<8x8xf32> -> vector<8x8xf32>
    %c0_45 = arith.constant 0 : index
    %c1_46 = arith.constant 1 : index
    %c0_47 = arith.constant 0 : index
    %c0_48 = arith.constant 0 : index
    %55 = vector.load %arg9[%c0_45, %c1_46, %c0_47, %c0_48] : memref<1x4x1x8xf32, #tpu.memory_space<vmem>>, vector<1x1x1x8xf32>
    %56 = vector.shape_cast %55 : vector<1x1x1x8xf32> to vector<1x8xf32>
    %57 = vector.broadcast %56 : vector<1x8xf32> to vector<8x8xf32>
    %58 = arith.addf %54, %57 : vector<8x8xf32>
    %c0_49 = arith.constant 0 : index
    %c1_50 = arith.constant 1 : index
    %c0_51 = arith.constant 0 : index
    %c0_52 = arith.constant 0 : index
    %59 = vector.load %arg7[%c0_49, %c1_50, %c0_51, %c0_52] : memref<1x4x32x8xbf16, #tpu.memory_space<vmem>>, vector<1x1x32x8xbf16>
    %60 = vector.shape_cast %59 : vector<1x1x32x8xbf16> to vector<32x8xbf16>
    %cst_53 = arith.constant dense<0.000000e+00> : vector<8x8xf32>
    %61 = tpu.matmul %4, %60, %cst_53 {dimension_numbers = #tpu.dot_dimension_numbers<[1], [0], [0], [1], [0, 0, 1, 1], [], []>} : vector<8x32xbf16>, vector<32x8xbf16>, vector<8x8xf32> -> vector<8x8xf32>
    %c0_54 = arith.constant 0 : index
    %c1_55 = arith.constant 1 : index
    %c0_56 = arith.constant 0 : index
    %c0_57 = arith.constant 0 : index
    %62 = vector.load %arg10[%c0_54, %c1_55, %c0_56, %c0_57] : memref<1x4x1x8xf32, #tpu.memory_space<vmem>>, vector<1x1x1x8xf32>
    %63 = vector.shape_cast %62 : vector<1x1x1x8xf32> to vector<1x8xf32>
    %64 = vector.broadcast %63 : vector<1x8xf32> to vector<8x8xf32>
    %65 = arith.addf %61, %64 : vector<8x8xf32>
    %c0_58 = arith.constant 0 : index
    %c1_59 = arith.constant 1 : index
    %c0_60 = arith.constant 0 : index
    %c0_61 = arith.constant 0 : index
    %66 = vector.load %arg8[%c0_58, %c1_59, %c0_60, %c0_61] : memref<1x4x32x8xbf16, #tpu.memory_space<vmem>>, vector<1x1x32x8xbf16>
    %67 = vector.shape_cast %66 : vector<1x1x32x8xbf16> to vector<32x8xbf16>
    %cst_62 = arith.constant dense<0.000000e+00> : vector<8x8xf32>
    %68 = tpu.matmul %4, %67, %cst_62 {dimension_numbers = #tpu.dot_dimension_numbers<[1], [0], [0], [1], [0, 0, 1, 1], [], []>} : vector<8x32xbf16>, vector<32x8xbf16>, vector<8x8xf32> -> vector<8x8xf32>
    %c0_63 = arith.constant 0 : index
    %c1_64 = arith.constant 1 : index
    %c0_65 = arith.constant 0 : index
    %c0_66 = arith.constant 0 : index
    %69 = vector.load %arg11[%c0_63, %c1_64, %c0_65, %c0_66] : memref<1x4x1x8xf32, #tpu.memory_space<vmem>>, vector<1x1x1x8xf32>
    %70 = vector.shape_cast %69 : vector<1x1x1x8xf32> to vector<1x8xf32>
    %71 = vector.broadcast %70 : vector<1x8xf32> to vector<8x8xf32>
    %72 = arith.addf %68, %71 : vector<8x8xf32>
    %73 = arith.truncf %58 : vector<8x8xf32> to vector<8x8xbf16>
    %74 = arith.truncf %65 : vector<8x8xf32> to vector<8x8xbf16>
    %cst_67 = arith.constant dense<0.000000e+00> : vector<8x8xf32>
    %75 = tpu.matmul %73, %74, %cst_67 {dimension_numbers = #tpu.dot_dimension_numbers<[1], [1], [0], [0], [0, 0, 1, 0], [], []>} : vector<8x8xbf16>, vector<8x8xbf16>, vector<8x8xf32> -> vector<8x8xf32>
    %cst_68 = arith.constant 0.353553385 : f32
    %76 = vector.broadcast %cst_68 : f32 to vector<8x8xf32>
    %77 = arith.mulf %75, %76 : vector<8x8xf32>
    %cst_69 = arith.constant dense<0xFF800000> : vector<8xf32>
    %78 = vector.multi_reduction <maximumf>, %77, %cst_69 [1] : vector<8x8xf32> to vector<8xf32>
    %79 = vector.shape_cast %78 : vector<8xf32> to vector<8x1xf32>
    %80 = vector.broadcast %79 : vector<8x1xf32> to vector<8x8xf32>
    %81 = arith.subf %77, %80 : vector<8x8xf32>
    %82 = math.exp %81 : vector<8x8xf32>
    %cst_70 = arith.constant dense<0.000000e+00> : vector<8xf32>
    %83 = vector.multi_reduction <add>, %82, %cst_70 [1] : vector<8x8xf32> to vector<8xf32>
    %84 = vector.shape_cast %83 : vector<8xf32> to vector<8x1xf32>
    %85 = tpu.reciprocal %84 {approx = true} : vector<8x1xf32> -> vector<8x1xf32>
    %86 = vector.broadcast %85 : vector<8x1xf32> to vector<8x8xf32>
    %87 = arith.mulf %82, %86 : vector<8x8xf32>
    %88 = arith.truncf %87 : vector<8x8xf32> to vector<8x8xbf16>
    %89 = arith.truncf %72 : vector<8x8xf32> to vector<8x8xbf16>
    %cst_71 = arith.constant dense<0.000000e+00> : vector<8x8xf32>
    %90 = tpu.matmul %88, %89, %cst_71 {dimension_numbers = #tpu.dot_dimension_numbers<[1], [0], [0], [1], [0, 0, 1, 1], [], []>} : vector<8x8xbf16>, vector<8x8xbf16>, vector<8x8xf32> -> vector<8x8xf32>
    %91 = arith.truncf %90 : vector<8x8xf32> to vector<8x8xbf16>
    %c0_72 = arith.constant 0 : index
    %c1_73 = arith.constant 1 : index
    %c0_74 = arith.constant 0 : index
    %c0_75 = arith.constant 0 : index
    %92 = vector.load %arg12[%c0_72, %c1_73, %c0_74, %c0_75] : memref<1x4x8x32xbf16, #tpu.memory_space<vmem>>, vector<1x1x8x32xbf16>
    %93 = vector.shape_cast %92 : vector<1x1x8x32xbf16> to vector<8x32xbf16>
    %cst_76 = arith.constant dense<0.000000e+00> : vector<8x32xf32>
    %94 = tpu.matmul %91, %93, %cst_76 {dimension_numbers = #tpu.dot_dimension_numbers<[1], [0], [0], [1], [0, 0, 1, 1], [], []>} : vector<8x8xbf16>, vector<8x32xbf16>, vector<8x32xf32> -> vector<8x32xf32>
    %95 = arith.addf %51, %94 : vector<8x32xf32>
    %c0_77 = arith.constant 0 : index
    %c2 = arith.constant 2 : index
    %c0_78 = arith.constant 0 : index
    %c0_79 = arith.constant 0 : index
    %96 = vector.load %arg6[%c0_77, %c2, %c0_78, %c0_79] : memref<1x4x32x8xbf16, #tpu.memory_space<vmem>>, vector<1x1x32x8xbf16>
    %97 = vector.shape_cast %96 : vector<1x1x32x8xbf16> to vector<32x8xbf16>
    %cst_80 = arith.constant dense<0.000000e+00> : vector<8x8xf32>
    %98 = tpu.matmul %4, %97, %cst_80 {dimension_numbers = #tpu.dot_dimension_numbers<[1], [0], [0], [1], [0, 0, 1, 1], [], []>} : vector<8x32xbf16>, vector<32x8xbf16>, vector<8x8xf32> -> vector<8x8xf32>
    %c0_81 = arith.constant 0 : index
    %c2_82 = arith.constant 2 : index
    %c0_83 = arith.constant 0 : index
    %c0_84 = arith.constant 0 : index
    %99 = vector.load %arg9[%c0_81, %c2_82, %c0_83, %c0_84] : memref<1x4x1x8xf32, #tpu.memory_space<vmem>>, vector<1x1x1x8xf32>
    %100 = vector.shape_cast %99 : vector<1x1x1x8xf32> to vector<1x8xf32>
    %101 = vector.broadcast %100 : vector<1x8xf32> to vector<8x8xf32>
    %102 = arith.addf %98, %101 : vector<8x8xf32>
    %c0_85 = arith.constant 0 : index
    %c2_86 = arith.constant 2 : index
    %c0_87 = arith.constant 0 : index
    %c0_88 = arith.constant 0 : index
    %103 = vector.load %arg7[%c0_85, %c2_86, %c0_87, %c0_88] : memref<1x4x32x8xbf16, #tpu.memory_space<vmem>>, vector<1x1x32x8xbf16>
    %104 = vector.shape_cast %103 : vector<1x1x32x8xbf16> to vector<32x8xbf16>
    %cst_89 = arith.constant dense<0.000000e+00> : vector<8x8xf32>
    %105 = tpu.matmul %4, %104, %cst_89 {dimension_numbers = #tpu.dot_dimension_numbers<[1], [0], [0], [1], [0, 0, 1, 1], [], []>} : vector<8x32xbf16>, vector<32x8xbf16>, vector<8x8xf32> -> vector<8x8xf32>
    %c0_90 = arith.constant 0 : index
    %c2_91 = arith.constant 2 : index
    %c0_92 = arith.constant 0 : index
    %c0_93 = arith.constant 0 : index
    %106 = vector.load %arg10[%c0_90, %c2_91, %c0_92, %c0_93] : memref<1x4x1x8xf32, #tpu.memory_space<vmem>>, vector<1x1x1x8xf32>
    %107 = vector.shape_cast %106 : vector<1x1x1x8xf32> to vector<1x8xf32>
    %108 = vector.broadcast %107 : vector<1x8xf32> to vector<8x8xf32>
    %109 = arith.addf %105, %108 : vector<8x8xf32>
    %c0_94 = arith.constant 0 : index
    %c2_95 = arith.constant 2 : index
    %c0_96 = arith.constant 0 : index
    %c0_97 = arith.constant 0 : index
    %110 = vector.load %arg8[%c0_94, %c2_95, %c0_96, %c0_97] : memref<1x4x32x8xbf16, #tpu.memory_space<vmem>>, vector<1x1x32x8xbf16>
    %111 = vector.shape_cast %110 : vector<1x1x32x8xbf16> to vector<32x8xbf16>
    %cst_98 = arith.constant dense<0.000000e+00> : vector<8x8xf32>
    %112 = tpu.matmul %4, %111, %cst_98 {dimension_numbers = #tpu.dot_dimension_numbers<[1], [0], [0], [1], [0, 0, 1, 1], [], []>} : vector<8x32xbf16>, vector<32x8xbf16>, vector<8x8xf32> -> vector<8x8xf32>
    %c0_99 = arith.constant 0 : index
    %c2_100 = arith.constant 2 : index
    %c0_101 = arith.constant 0 : index
    %c0_102 = arith.constant 0 : index
    %113 = vector.load %arg11[%c0_99, %c2_100, %c0_101, %c0_102] : memref<1x4x1x8xf32, #tpu.memory_space<vmem>>, vector<1x1x1x8xf32>
    %114 = vector.shape_cast %113 : vector<1x1x1x8xf32> to vector<1x8xf32>
    %115 = vector.broadcast %114 : vector<1x8xf32> to vector<8x8xf32>
    %116 = arith.addf %112, %115 : vector<8x8xf32>
    %117 = arith.truncf %102 : vector<8x8xf32> to vector<8x8xbf16>
    %118 = arith.truncf %109 : vector<8x8xf32> to vector<8x8xbf16>
    %cst_103 = arith.constant dense<0.000000e+00> : vector<8x8xf32>
    %119 = tpu.matmul %117, %118, %cst_103 {dimension_numbers = #tpu.dot_dimension_numbers<[1], [1], [0], [0], [0, 0, 1, 0], [], []>} : vector<8x8xbf16>, vector<8x8xbf16>, vector<8x8xf32> -> vector<8x8xf32>
    %cst_104 = arith.constant 0.353553385 : f32
    %120 = vector.broadcast %cst_104 : f32 to vector<8x8xf32>
    %121 = arith.mulf %119, %120 : vector<8x8xf32>
    %cst_105 = arith.constant dense<0xFF800000> : vector<8xf32>
    %122 = vector.multi_reduction <maximumf>, %121, %cst_105 [1] : vector<8x8xf32> to vector<8xf32>
    %123 = vector.shape_cast %122 : vector<8xf32> to vector<8x1xf32>
    %124 = vector.broadcast %123 : vector<8x1xf32> to vector<8x8xf32>
    %125 = arith.subf %121, %124 : vector<8x8xf32>
    %126 = math.exp %125 : vector<8x8xf32>
    %cst_106 = arith.constant dense<0.000000e+00> : vector<8xf32>
    %127 = vector.multi_reduction <add>, %126, %cst_106 [1] : vector<8x8xf32> to vector<8xf32>
    %128 = vector.shape_cast %127 : vector<8xf32> to vector<8x1xf32>
    %129 = tpu.reciprocal %128 {approx = true} : vector<8x1xf32> -> vector<8x1xf32>
    %130 = vector.broadcast %129 : vector<8x1xf32> to vector<8x8xf32>
    %131 = arith.mulf %126, %130 : vector<8x8xf32>
    %132 = arith.truncf %131 : vector<8x8xf32> to vector<8x8xbf16>
    %133 = arith.truncf %116 : vector<8x8xf32> to vector<8x8xbf16>
    %cst_107 = arith.constant dense<0.000000e+00> : vector<8x8xf32>
    %134 = tpu.matmul %132, %133, %cst_107 {dimension_numbers = #tpu.dot_dimension_numbers<[1], [0], [0], [1], [0, 0, 1, 1], [], []>} : vector<8x8xbf16>, vector<8x8xbf16>, vector<8x8xf32> -> vector<8x8xf32>
    %135 = arith.truncf %134 : vector<8x8xf32> to vector<8x8xbf16>
    %c0_108 = arith.constant 0 : index
    %c2_109 = arith.constant 2 : index
    %c0_110 = arith.constant 0 : index
    %c0_111 = arith.constant 0 : index
    %136 = vector.load %arg12[%c0_108, %c2_109, %c0_110, %c0_111] : memref<1x4x8x32xbf16, #tpu.memory_space<vmem>>, vector<1x1x8x32xbf16>
    %137 = vector.shape_cast %136 : vector<1x1x8x32xbf16> to vector<8x32xbf16>
    %cst_112 = arith.constant dense<0.000000e+00> : vector<8x32xf32>
    %138 = tpu.matmul %135, %137, %cst_112 {dimension_numbers = #tpu.dot_dimension_numbers<[1], [0], [0], [1], [0, 0, 1, 1], [], []>} : vector<8x8xbf16>, vector<8x32xbf16>, vector<8x32xf32> -> vector<8x32xf32>
    %139 = arith.addf %95, %138 : vector<8x32xf32>
    %c0_113 = arith.constant 0 : index
    %c3 = arith.constant 3 : index
    %c0_114 = arith.constant 0 : index
    %c0_115 = arith.constant 0 : index
    %140 = vector.load %arg6[%c0_113, %c3, %c0_114, %c0_115] : memref<1x4x32x8xbf16, #tpu.memory_space<vmem>>, vector<1x1x32x8xbf16>
    %141 = vector.shape_cast %140 : vector<1x1x32x8xbf16> to vector<32x8xbf16>
    %cst_116 = arith.constant dense<0.000000e+00> : vector<8x8xf32>
    %142 = tpu.matmul %4, %141, %cst_116 {dimension_numbers = #tpu.dot_dimension_numbers<[1], [0], [0], [1], [0, 0, 1, 1], [], []>} : vector<8x32xbf16>, vector<32x8xbf16>, vector<8x8xf32> -> vector<8x8xf32>
    %c0_117 = arith.constant 0 : index
    %c3_118 = arith.constant 3 : index
    %c0_119 = arith.constant 0 : index
    %c0_120 = arith.constant 0 : index
    %143 = vector.load %arg9[%c0_117, %c3_118, %c0_119, %c0_120] : memref<1x4x1x8xf32, #tpu.memory_space<vmem>>, vector<1x1x1x8xf32>
    %144 = vector.shape_cast %143 : vector<1x1x1x8xf32> to vector<1x8xf32>
    %145 = vector.broadcast %144 : vector<1x8xf32> to vector<8x8xf32>
    %146 = arith.addf %142, %145 : vector<8x8xf32>
    %c0_121 = arith.constant 0 : index
    %c3_122 = arith.constant 3 : index
    %c0_123 = arith.constant 0 : index
    %c0_124 = arith.constant 0 : index
    %147 = vector.load %arg7[%c0_121, %c3_122, %c0_123, %c0_124] : memref<1x4x32x8xbf16, #tpu.memory_space<vmem>>, vector<1x1x32x8xbf16>
    %148 = vector.shape_cast %147 : vector<1x1x32x8xbf16> to vector<32x8xbf16>
    %cst_125 = arith.constant dense<0.000000e+00> : vector<8x8xf32>
    %149 = tpu.matmul %4, %148, %cst_125 {dimension_numbers = #tpu.dot_dimension_numbers<[1], [0], [0], [1], [0, 0, 1, 1], [], []>} : vector<8x32xbf16>, vector<32x8xbf16>, vector<8x8xf32> -> vector<8x8xf32>
    %c0_126 = arith.constant 0 : index
    %c3_127 = arith.constant 3 : index
    %c0_128 = arith.constant 0 : index
    %c0_129 = arith.constant 0 : index
    %150 = vector.load %arg10[%c0_126, %c3_127, %c0_128, %c0_129] : memref<1x4x1x8xf32, #tpu.memory_space<vmem>>, vector<1x1x1x8xf32>
    %151 = vector.shape_cast %150 : vector<1x1x1x8xf32> to vector<1x8xf32>
    %152 = vector.broadcast %151 : vector<1x8xf32> to vector<8x8xf32>
    %153 = arith.addf %149, %152 : vector<8x8xf32>
    %c0_130 = arith.constant 0 : index
    %c3_131 = arith.constant 3 : index
    %c0_132 = arith.constant 0 : index
    %c0_133 = arith.constant 0 : index
    %154 = vector.load %arg8[%c0_130, %c3_131, %c0_132, %c0_133] : memref<1x4x32x8xbf16, #tpu.memory_space<vmem>>, vector<1x1x32x8xbf16>
    %155 = vector.shape_cast %154 : vector<1x1x32x8xbf16> to vector<32x8xbf16>
    %cst_134 = arith.constant dense<0.000000e+00> : vector<8x8xf32>
    %156 = tpu.matmul %4, %155, %cst_134 {dimension_numbers = #tpu.dot_dimension_numbers<[1], [0], [0], [1], [0, 0, 1, 1], [], []>} : vector<8x32xbf16>, vector<32x8xbf16>, vector<8x8xf32> -> vector<8x8xf32>
    %c0_135 = arith.constant 0 : index
    %c3_136 = arith.constant 3 : index
    %c0_137 = arith.constant 0 : index
    %c0_138 = arith.constant 0 : index
    %157 = vector.load %arg11[%c0_135, %c3_136, %c0_137, %c0_138] : memref<1x4x1x8xf32, #tpu.memory_space<vmem>>, vector<1x1x1x8xf32>
    %158 = vector.shape_cast %157 : vector<1x1x1x8xf32> to vector<1x8xf32>
    %159 = vector.broadcast %158 : vector<1x8xf32> to vector<8x8xf32>
    %160 = arith.addf %156, %159 : vector<8x8xf32>
    %161 = arith.truncf %146 : vector<8x8xf32> to vector<8x8xbf16>
    %162 = arith.truncf %153 : vector<8x8xf32> to vector<8x8xbf16>
    %cst_139 = arith.constant dense<0.000000e+00> : vector<8x8xf32>
    %163 = tpu.matmul %161, %162, %cst_139 {dimension_numbers = #tpu.dot_dimension_numbers<[1], [1], [0], [0], [0, 0, 1, 0], [], []>} : vector<8x8xbf16>, vector<8x8xbf16>, vector<8x8xf32> -> vector<8x8xf32>
    %cst_140 = arith.constant 0.353553385 : f32
    %164 = vector.broadcast %cst_140 : f32 to vector<8x8xf32>
    %165 = arith.mulf %163, %164 : vector<8x8xf32>
    %cst_141 = arith.constant dense<0xFF800000> : vector<8xf32>
    %166 = vector.multi_reduction <maximumf>, %165, %cst_141 [1] : vector<8x8xf32> to vector<8xf32>
    %167 = vector.shape_cast %166 : vector<8xf32> to vector<8x1xf32>
    %168 = vector.broadcast %167 : vector<8x1xf32> to vector<8x8xf32>
    %169 = arith.subf %165, %168 : vector<8x8xf32>
    %170 = math.exp %169 : vector<8x8xf32>
    %cst_142 = arith.constant dense<0.000000e+00> : vector<8xf32>
    %171 = vector.multi_reduction <add>, %170, %cst_142 [1] : vector<8x8xf32> to vector<8xf32>
    %172 = vector.shape_cast %171 : vector<8xf32> to vector<8x1xf32>
    %173 = tpu.reciprocal %172 {approx = true} : vector<8x1xf32> -> vector<8x1xf32>
    %174 = vector.broadcast %173 : vector<8x1xf32> to vector<8x8xf32>
    %175 = arith.mulf %170, %174 : vector<8x8xf32>
    %176 = arith.truncf %175 : vector<8x8xf32> to vector<8x8xbf16>
    %177 = arith.truncf %160 : vector<8x8xf32> to vector<8x8xbf16>
    %cst_143 = arith.constant dense<0.000000e+00> : vector<8x8xf32>
    %178 = tpu.matmul %176, %177, %cst_143 {dimension_numbers = #tpu.dot_dimension_numbers<[1], [0], [0], [1], [0, 0, 1, 1], [], []>} : vector<8x8xbf16>, vector<8x8xbf16>, vector<8x8xf32> -> vector<8x8xf32>
    %179 = arith.truncf %178 : vector<8x8xf32> to vector<8x8xbf16>
    %c0_144 = arith.constant 0 : index
    %c3_145 = arith.constant 3 : index
    %c0_146 = arith.constant 0 : index
    %c0_147 = arith.constant 0 : index
    %180 = vector.load %arg12[%c0_144, %c3_145, %c0_146, %c0_147] : memref<1x4x8x32xbf16, #tpu.memory_space<vmem>>, vector<1x1x8x32xbf16>
    %181 = vector.shape_cast %180 : vector<1x1x8x32xbf16> to vector<8x32xbf16>
    %cst_148 = arith.constant dense<0.000000e+00> : vector<8x32xf32>
    %182 = tpu.matmul %179, %181, %cst_148 {dimension_numbers = #tpu.dot_dimension_numbers<[1], [0], [0], [1], [0, 0, 1, 1], [], []>} : vector<8x8xbf16>, vector<8x32xbf16>, vector<8x32xf32> -> vector<8x32xf32>
    %183 = arith.addf %139, %182 : vector<8x32xf32>
    %184 = arith.addf %3, %183 : vector<8x32xf32>
    %c0_149 = arith.constant 0 : index
    %c0_150 = arith.constant 0 : index
    %c0_151 = arith.constant 0 : index
    %185 = vector.load %arg14[%c0_149, %c0_150, %c0_151] : memref<1x1x32xf32, #tpu.memory_space<vmem>>, vector<1x1x32xf32>
    %186 = vector.shape_cast %185 : vector<1x1x32xf32> to vector<1x32xf32>
    %c0_152 = arith.constant 0 : index
    %c0_153 = arith.constant 0 : index
    %c0_154 = arith.constant 0 : index
    %187 = vector.load %arg15[%c0_152, %c0_153, %c0_154] : memref<1x1x32xf32, #tpu.memory_space<vmem>>, vector<1x1x32xf32>
    %188 = vector.shape_cast %187 : vector<1x1x32xf32> to vector<1x32xf32>
    %cst_155 = arith.constant dense<0.000000e+00> : vector<8xf32>
    %189 = vector.multi_reduction <add>, %184, %cst_155 [1] : vector<8x32xf32> to vector<8xf32>
    %190 = vector.shape_cast %189 : vector<8xf32> to vector<8x1xf32>
    %cst_156 = arith.constant 3.200000e+01 : f32
    %191 = vector.broadcast %cst_156 : f32 to vector<8x1xf32>
    %192 = arith.divf %190, %191 : vector<8x1xf32>
    %193 = vector.broadcast %192 : vector<8x1xf32> to vector<8x32xf32>
    %194 = arith.subf %184, %193 : vector<8x32xf32>
    %195 = arith.mulf %194, %194 : vector<8x32xf32>
    %cst_157 = arith.constant dense<0.000000e+00> : vector<8xf32>
    %196 = vector.multi_reduction <add>, %195, %cst_157 [1] : vector<8x32xf32> to vector<8xf32>
    %197 = vector.shape_cast %196 : vector<8xf32> to vector<8x1xf32>
    %cst_158 = arith.constant 3.200000e+01 : f32
    %198 = vector.broadcast %cst_158 : f32 to vector<8x1xf32>
    %199 = arith.divf %197, %198 : vector<8x1xf32>
    %200 = vector.broadcast %192 : vector<8x1xf32> to vector<8x32xf32>
    %201 = arith.subf %184, %200 : vector<8x32xf32>
    %cst_159 = arith.constant 9.99999974E-6 : f32
    %202 = vector.broadcast %cst_159 : f32 to vector<8x1xf32>
    %203 = arith.addf %199, %202 : vector<8x1xf32>
    %204 = math.rsqrt %203 : vector<8x1xf32>
    %205 = vector.broadcast %204 : vector<8x1xf32> to vector<8x32xf32>
    %206 = arith.mulf %201, %205 : vector<8x32xf32>
    %207 = vector.broadcast %186 : vector<1x32xf32> to vector<8x32xf32>
    %208 = arith.mulf %206, %207 : vector<8x32xf32>
    %209 = vector.broadcast %188 : vector<1x32xf32> to vector<8x32xf32>
    %210 = arith.addf %208, %209 : vector<8x32xf32>
    %211 = arith.truncf %210 : vector<8x32xf32> to vector<8x32xbf16>
    %c0_160 = arith.constant 0 : index
    %c0_161 = arith.constant 0 : index
    %c0_162 = arith.constant 0 : index
    %212 = vector.load %arg16[%c0_160, %c0_161, %c0_162] : memref<1x32x2048xbf16, #tpu.memory_space<vmem>>, vector<1x32x2048xbf16>
    %213 = vector.shape_cast %212 : vector<1x32x2048xbf16> to vector<32x2048xbf16>
    %cst_163 = arith.constant dense<0.000000e+00> : vector<8x2048xf32>
    %214 = tpu.matmul %211, %213, %cst_163 {dimension_numbers = #tpu.dot_dimension_numbers<[1], [0], [0], [1], [0, 0, 1, 1], [], []>} : vector<8x32xbf16>, vector<32x2048xbf16>, vector<8x2048xf32> -> vector<8x2048xf32>
    %c0_164 = arith.constant 0 : index
    %c0_165 = arith.constant 0 : index
    %c0_166 = arith.constant 0 : index
    %215 = vector.load %arg17[%c0_164, %c0_165, %c0_166] : memref<1x1x2048xf32, #tpu.memory_space<vmem>>, vector<1x1x2048xf32>
    %216 = vector.shape_cast %215 : vector<1x1x2048xf32> to vector<1x2048xf32>
    %217 = vector.broadcast %216 : vector<1x2048xf32> to vector<8x2048xf32>
    %218 = arith.addf %214, %217 : vector<8x2048xf32>
    %cst_167 = arith.constant 0.000000e+00 : f32
    %219 = vector.broadcast %cst_167 : f32 to vector<8x2048xf32>
    %220 = arith.maximumf %218, %219 : vector<8x2048xf32>
    %221 = arith.truncf %220 : vector<8x2048xf32> to vector<8x2048xbf16>
    %c0_168 = arith.constant 0 : index
    %c0_169 = arith.constant 0 : index
    %c0_170 = arith.constant 0 : index
    %222 = vector.load %arg18[%c0_168, %c0_169, %c0_170] : memref<1x2048x32xbf16, #tpu.memory_space<vmem>>, vector<1x2048x32xbf16>
    %223 = vector.shape_cast %222 : vector<1x2048x32xbf16> to vector<2048x32xbf16>
    %cst_171 = arith.constant dense<0.000000e+00> : vector<8x32xf32>
    %224 = tpu.matmul %221, %223, %cst_171 {dimension_numbers = #tpu.dot_dimension_numbers<[1], [0], [0], [1], [0, 0, 1, 1], [], []>} : vector<8x2048xbf16>, vector<2048x32xbf16>, vector<8x32xf32> -> vector<8x32xf32>
    %c0_172 = arith.constant 0 : index
    %c0_173 = arith.constant 0 : index
    %c0_174 = arith.constant 0 : index
    %225 = vector.load %arg19[%c0_172, %c0_173, %c0_174] : memref<1x1x32xf32, #tpu.memory_space<vmem>>, vector<1x1x32xf32>
    %226 = vector.shape_cast %225 : vector<1x1x32xf32> to vector<1x32xf32>
    %227 = vector.broadcast %226 : vector<1x32xf32> to vector<8x32xf32>
    %228 = arith.addf %224, %227 : vector<8x32xf32>
    %229 = arith.addf %210, %228 : vector<8x32xf32>
    %c0_175 = arith.constant 0 : index
    %c0_176 = arith.constant 0 : index
    %c0_177 = arith.constant 0 : index
    %230 = vector.load %arg20[%c0_175, %c0_176, %c0_177] : memref<1x1x32xf32, #tpu.memory_space<vmem>>, vector<1x1x32xf32>
    %231 = vector.shape_cast %230 : vector<1x1x32xf32> to vector<1x32xf32>
    %c0_178 = arith.constant 0 : index
    %c0_179 = arith.constant 0 : index
    %c0_180 = arith.constant 0 : index
    %232 = vector.load %arg21[%c0_178, %c0_179, %c0_180] : memref<1x1x32xf32, #tpu.memory_space<vmem>>, vector<1x1x32xf32>
    %233 = vector.shape_cast %232 : vector<1x1x32xf32> to vector<1x32xf32>
    %cst_181 = arith.constant dense<0.000000e+00> : vector<8xf32>
    %234 = vector.multi_reduction <add>, %229, %cst_181 [1] : vector<8x32xf32> to vector<8xf32>
    %235 = vector.shape_cast %234 : vector<8xf32> to vector<8x1xf32>
    %cst_182 = arith.constant 3.200000e+01 : f32
    %236 = vector.broadcast %cst_182 : f32 to vector<8x1xf32>
    %237 = arith.divf %235, %236 : vector<8x1xf32>
    %238 = vector.broadcast %237 : vector<8x1xf32> to vector<8x32xf32>
    %239 = arith.subf %229, %238 : vector<8x32xf32>
    %240 = arith.mulf %239, %239 : vector<8x32xf32>
    %cst_183 = arith.constant dense<0.000000e+00> : vector<8xf32>
    %241 = vector.multi_reduction <add>, %240, %cst_183 [1] : vector<8x32xf32> to vector<8xf32>
    %242 = vector.shape_cast %241 : vector<8xf32> to vector<8x1xf32>
    %cst_184 = arith.constant 3.200000e+01 : f32
    %243 = vector.broadcast %cst_184 : f32 to vector<8x1xf32>
    %244 = arith.divf %242, %243 : vector<8x1xf32>
    %245 = vector.broadcast %237 : vector<8x1xf32> to vector<8x32xf32>
    %246 = arith.subf %229, %245 : vector<8x32xf32>
    %cst_185 = arith.constant 9.99999974E-6 : f32
    %247 = vector.broadcast %cst_185 : f32 to vector<8x1xf32>
    %248 = arith.addf %244, %247 : vector<8x1xf32>
    %249 = math.rsqrt %248 : vector<8x1xf32>
    %250 = vector.broadcast %249 : vector<8x1xf32> to vector<8x32xf32>
    %251 = arith.mulf %246, %250 : vector<8x32xf32>
    %252 = vector.broadcast %231 : vector<1x32xf32> to vector<8x32xf32>
    %253 = arith.mulf %251, %252 : vector<8x32xf32>
    %254 = vector.broadcast %233 : vector<1x32xf32> to vector<8x32xf32>
    %255 = arith.addf %253, %254 : vector<8x32xf32>
    %c0_186 = arith.constant 0 : index
    %c0_187 = arith.constant 0 : index
    %256 = vector.load %arg25[%c0_186, %c0_187] : memref<8x32xf32, #tpu.memory_space<vmem>>, vector<8x32xf32>
    tpu.vector_store %arg25[%c0_186, %c0_187], %255 {strides = array<i32>} : memref<8x32xf32, #tpu.memory_space<vmem>>, vector<8x32xf32>,
    %c1_i32 = arith.constant 1 : i32
    %257 = arith.cmpi eq, %arg1, %c1_i32 : i32
    %258 = arith.extui %257 : i1 to i32
    %c0_i32_188 = arith.constant 0 : i32
    %259 = arith.cmpi ne, %258, %c0_i32_188 : i32
    scf.if %259 {
      %260 = vector.extract_strided_slice %255 {offsets = [7, 0], sizes = [1, 32], strides = [1, 1]} : vector<8x32xf32> to vector<1x32xf32>
      %261 = arith.truncf %260 : vector<1x32xf32> to vector<1x32xbf16>
      %c0_189 = arith.constant 0 : index
      %c0_190 = arith.constant 0 : index
      %262 = vector.load %arg22[%c0_189, %c0_190] : memref<32x8xbf16, #tpu.memory_space<vmem>>, vector<32x8xbf16>
      %cst_191 = arith.constant dense<0.000000e+00> : vector<1x8xf32>
      %263 = tpu.matmul %261, %262, %cst_191 {dimension_numbers = #tpu.dot_dimension_numbers<[1], [0], [0], [1], [0, 0, 1, 1], [], []>} : vector<1x32xbf16>, vector<32x8xbf16>, vector<1x8xf32> -> vector<1x8xf32>
      %c0_192 = arith.constant 0 : index
      %c0_193 = arith.constant 0 : index
      %264 = vector.load %arg23[%c0_192, %c0_193] : memref<1x8xf32, #tpu.memory_space<vmem>>, vector<1x8xf32>
      %265 = arith.addf %263, %264 : vector<1x8xf32>
      %c0_194 = arith.constant 0 : index
      %c0_195 = arith.constant 0 : index
      %c0_196 = arith.constant 0 : index
      %266 = vector.load %arg24[%c0_194, %c0_195, %c0_196] : memref<1x1x8xf32, #tpu.memory_space<vmem>>, vector<1x1x8xf32>
      %267 = vector.shape_cast %266 : vector<1x1x8xf32> to vector<1x8xf32>
      %268 = vector.shape_cast %265 : vector<1x8xf32> to vector<1x1x8xf32>
      tpu.vector_store %arg24[%c0_194, %c0_195, %c0_196], %268 {strides = array<i32>} : memref<1x1x8xf32, #tpu.memory_space<vmem>>, vector<1x1x8xf32>,
    } else {
    }
    return
  }
  func.func @transform_0(%arg0: i32, %arg1: i32) -> (i32, i32, i32) {
    %c0_i32 = arith.constant 0 : i32
    %c0_i32_0 = arith.constant 0 : i32
    %c0_i32_1 = arith.constant 0 : i32
    return %arg0, %c0_i32, %c0_i32_0 : i32, i32, i32
  }
  func.func @transform_1(%arg0: i32, %arg1: i32) -> (i32, i32) {
    %c0_i32 = arith.constant 0 : i32
    %c0_i32_0 = arith.constant 0 : i32
    %c0_i32_1 = arith.constant 0 : i32
    return %c0_i32, %c0_i32_0 : i32, i32
  }
  func.func @transform_2(%arg0: i32, %arg1: i32) -> (i32, i32) {
    %c0_i32 = arith.constant 0 : i32
    %c0_i32_0 = arith.constant 0 : i32
    %c0_i32_1 = arith.constant 0 : i32
    return %c0_i32, %c0_i32_0 : i32, i32
  }
  func.func @transform_3(%arg0: i32, %arg1: i32) -> (i32, i32) {
    %c0_i32 = arith.constant 0 : i32
    %c0_i32_0 = arith.constant 0 : i32
    %c0_i32_1 = arith.constant 0 : i32
    return %c0_i32, %c0_i32_0 : i32, i32
  }
  func.func @transform_4(%arg0: i32, %arg1: i32) -> (i32, i32, i32, i32) {
    %c0_i32 = arith.constant 0 : i32
    %c0_i32_0 = arith.constant 0 : i32
    %c0_i32_1 = arith.constant 0 : i32
    %c0_i32_2 = arith.constant 0 : i32
    return %arg1, %c0_i32, %c0_i32_0, %c0_i32_1 : i32, i32, i32, i32
  }
  func.func @transform_5(%arg0: i32, %arg1: i32) -> (i32, i32, i32, i32) {
    %c0_i32 = arith.constant 0 : i32
    %c0_i32_0 = arith.constant 0 : i32
    %c0_i32_1 = arith.constant 0 : i32
    %c0_i32_2 = arith.constant 0 : i32
    return %arg1, %c0_i32, %c0_i32_0, %c0_i32_1 : i32, i32, i32, i32
  }
  func.func @transform_6(%arg0: i32, %arg1: i32) -> (i32, i32, i32, i32) {
    %c0_i32 = arith.constant 0 : i32
    %c0_i32_0 = arith.constant 0 : i32
    %c0_i32_1 = arith.constant 0 : i32
    %c0_i32_2 = arith.constant 0 : i32
    return %arg1, %c0_i32, %c0_i32_0, %c0_i32_1 : i32, i32, i32, i32
  }
  func.func @transform_7(%arg0: i32, %arg1: i32) -> (i32, i32, i32, i32) {
    %c0_i32 = arith.constant 0 : i32
    %c0_i32_0 = arith.constant 0 : i32
    %c0_i32_1 = arith.constant 0 : i32
    %c0_i32_2 = arith.constant 0 : i32
    return %arg1, %c0_i32, %c0_i32_0, %c0_i32_1 : i32, i32, i32, i32
  }
  func.func @transform_8(%arg0: i32, %arg1: i32) -> (i32, i32, i32, i32) {
    %c0_i32 = arith.constant 0 : i32
    %c0_i32_0 = arith.constant 0 : i32
    %c0_i32_1 = arith.constant 0 : i32
    %c0_i32_2 = arith.constant 0 : i32
    return %arg1, %c0_i32, %c0_i32_0, %c0_i32_1 : i32, i32, i32, i32
  }
  func.func @transform_9(%arg0: i32, %arg1: i32) -> (i32, i32, i32, i32) {
    %c0_i32 = arith.constant 0 : i32
    %c0_i32_0 = arith.constant 0 : i32
    %c0_i32_1 = arith.constant 0 : i32
    %c0_i32_2 = arith.constant 0 : i32
    return %arg1, %c0_i32, %c0_i32_0, %c0_i32_1 : i32, i32, i32, i32
  }
  func.func @transform_10(%arg0: i32, %arg1: i32) -> (i32, i32, i32, i32) {
    %c0_i32 = arith.constant 0 : i32
    %c0_i32_0 = arith.constant 0 : i32
    %c0_i32_1 = arith.constant 0 : i32
    %c0_i32_2 = arith.constant 0 : i32
    return %arg1, %c0_i32, %c0_i32_0, %c0_i32_1 : i32, i32, i32, i32
  }
  func.func @transform_11(%arg0: i32, %arg1: i32) -> (i32, i32, i32) {
    %c0_i32 = arith.constant 0 : i32
    %c0_i32_0 = arith.constant 0 : i32
    %c0_i32_1 = arith.constant 0 : i32
    return %arg1, %c0_i32, %c0_i32_0 : i32, i32, i32
  }
  func.func @transform_12(%arg0: i32, %arg1: i32) -> (i32, i32, i32) {
    %c0_i32 = arith.constant 0 : i32
    %c0_i32_0 = arith.constant 0 : i32
    %c0_i32_1 = arith.constant 0 : i32
    return %arg1, %c0_i32, %c0_i32_0 : i32, i32, i32
  }
  func.func @transform_13(%arg0: i32, %arg1: i32) -> (i32, i32, i32) {
    %c0_i32 = arith.constant 0 : i32
    %c0_i32_0 = arith.constant 0 : i32
    %c0_i32_1 = arith.constant 0 : i32
    return %arg1, %c0_i32, %c0_i32_0 : i32, i32, i32
  }
  func.func @transform_14(%arg0: i32, %arg1: i32) -> (i32, i32, i32) {
    %c0_i32 = arith.constant 0 : i32
    %c0_i32_0 = arith.constant 0 : i32
    %c0_i32_1 = arith.constant 0 : i32
    return %arg1, %c0_i32, %c0_i32_0 : i32, i32, i32
  }
  func.func @transform_15(%arg0: i32, %arg1: i32) -> (i32, i32, i32) {
    %c0_i32 = arith.constant 0 : i32
    %c0_i32_0 = arith.constant 0 : i32
    %c0_i32_1 = arith.constant 0 : i32
    return %arg1, %c0_i32, %c0_i32_0 : i32, i32, i32
  }
  func.func @transform_16(%arg0: i32, %arg1: i32) -> (i32, i32, i32) {
    %c0_i32 = arith.constant 0 : i32
    %c0_i32_0 = arith.constant 0 : i32
    %c0_i32_1 = arith.constant 0 : i32
    return %arg1, %c0_i32, %c0_i32_0 : i32, i32, i32
  }
  func.func @transform_17(%arg0: i32, %arg1: i32) -> (i32, i32, i32) {
    %c0_i32 = arith.constant 0 : i32
    %c0_i32_0 = arith.constant 0 : i32
    %c0_i32_1 = arith.constant 0 : i32
    return %arg1, %c0_i32, %c0_i32_0 : i32, i32, i32
  }
  func.func @transform_18(%arg0: i32, %arg1: i32) -> (i32, i32, i32) {
    %c0_i32 = arith.constant 0 : i32
    %c0_i32_0 = arith.constant 0 : i32
    %c0_i32_1 = arith.constant 0 : i32
    return %arg1, %c0_i32, %c0_i32_0 : i32, i32, i32
  }
  func.func @transform_19(%arg0: i32, %arg1: i32) -> (i32, i32, i32) {
    %c0_i32 = arith.constant 0 : i32
    %c0_i32_0 = arith.constant 0 : i32
    %c0_i32_1 = arith.constant 0 : i32
    return %arg1, %c0_i32, %c0_i32_0 : i32, i32, i32
  }
  func.func @transform_20(%arg0: i32, %arg1: i32) -> (i32, i32) {
    %c0_i32 = arith.constant 0 : i32
    %c0_i32_0 = arith.constant 0 : i32
    %c0_i32_1 = arith.constant 0 : i32
    return %c0_i32, %c0_i32_0 : i32, i32
  }
  func.func @transform_21(%arg0: i32, %arg1: i32) -> (i32, i32) {
    %c0_i32 = arith.constant 0 : i32
    %c0_i32_0 = arith.constant 0 : i32
    %c0_i32_1 = arith.constant 0 : i32
    return %c0_i32, %c0_i32_0 : i32, i32
  }
  func.func @transform_22(%arg0: i32, %arg1: i32) -> (i32, i32, i32) {
    %c0_i32 = arith.constant 0 : i32
    %c0_i32_0 = arith.constant 0 : i32
    %c0_i32_1 = arith.constant 0 : i32
    return %arg0, %c0_i32, %c0_i32_0 : i32, i32, i32
  }
}

</mosaic_0001>

<bundles_post_ra>
// kernel: transformer_predictor_forward.1
= control target key start
LH: loop header
LB: loop body
LE: loop exit
PB: predicated region body
PF: predicated region fallthrough
CT: control target
= control target key end

     0   :  { %s6779_s0 = inlined_call_operand.vmem [shape: f32[2,8,16], index: 0, kind: input, shape index: {}]   ;;  %s6780_s1 = inlined_call_operand.vmem [shape: f32[8,32], index: 1, kind: input, shape index: {}]   ;;  %s6781_s2 = inlined_call_operand.vmem [shape: bf16[16,32], index: 2, kind: input, shape index: {}]   ;;  %s6782_s3 = inlined_call_operand.vmem [shape: f32[1,32], index: 3, kind: input, shape index: {}]   ;;  %s6783_s4 = inlined_call_operand.vmem [shape: bf16[2,4,32,8], index: 4, kind: input, shape index: {}]   ;;  %s6784_s5 = inlined_call_operand.vmem [shape: bf16[2,4,32,8], index: 5, kind: input, shape index: {}]   ;;  %s6785_s6 = inlined_call_operand.vmem [shape: bf16[2,4,32,8], index: 6, kind: input, shape index: {}]   ;;  %s6786_s7 = inlined_call_operand.vmem [shape: f32[2,4,1,8], index: 7, kind: input, shape index: {}]   ;;  %s6787_s8 = inlined_call_operand.vmem [shape: f32[2,4,1,8], index: 8, kind: input, shape index: {}]   ;;  %s6788_s9 = inlined_call_operand.vmem [shape: f32[2,4,1,8], index: 9, kind: input, shape index: {}]   ;;  %s6789_s10 = inlined_call_operand.vmem [shape: bf16[2,4,8,32], index: 10, kind: input, shape index: {}]   ;;  %s6790_s11 = inlined_call_operand.vmem [shape: f32[2,1,32], index: 11, kind: input, shape index: {}]   ;;  %s6791_s12 = inlined_call_operand.vmem [shape: f32[2,1,32], index: 12, kind: input, shape index: {}]   ;;  %s6792_s13 = inlined_call_operand.vmem [shape: f32[2,1,32], index: 13, kind: input, shape index: {}]   ;;  %s6793_s14 = inlined_call_operand.vmem [shape: bf16[2,32,2048], index: 14, kind: input, shape index: {}]   ;;  %s6794_s15 = inlined_call_operand.vmem [shape: f32[2,1,2048], index: 15, kind: input, shape index: {}]   ;;  %s6795_s16 = inlined_call_operand.vmem [shape: bf16[2,2048,32], index: 16, kind: input, shape index: {}]   ;;  %s6796_s17 = inlined_call_operand.vmem [shape: f32[2,1,32], index: 17, kind: input, shape index: {}]   ;;  %s6797_s18 = inlined_call_operand.vmem [shape: f32[2,1,32], index: 18, kind: input, shape index: {}]   ;;  %s6798_s19 = inlined_call_operand.vmem [shape: f32[2,1,32], index: 19, kind: input, shape index: {}]   ;;  %s6799_s20 = inlined_call_operand.vmem [shape: bf16[32,8], index: 20, kind: input, shape index: {}]   ;;  %s6800_s21 = inlined_call_operand.vmem [shape: f32[1,8], index: 21, kind: input, shape index: {}]   ;;  %s6801_s22 = inlined_call_operand.hbm [shape: f32[2,1,8], index: 22, kind: output, shape index: {}]  }
   0x1   :  { %6820 = sst [smem:[#allocation22_spill]] %s6779_s0 }
   0x2   :  { %6821 = sst [smem:[#allocation23_spill]] %s6780_s1 }
   0x3   :  { %6822 = sst [smem:[#allocation24_spill]] %s6781_s2 }
   0x4   :  { %6823 = sst [smem:[#allocation25_spill]] %s6782_s3 }
   0x5   :  { %6824 = sst [smem:[#allocation26_spill]] %s6783_s4 }
   0x6   :  { %6825 = sst [smem:[#allocation27_spill]] %s6784_s5 }
   0x7   :  { %6826 = sst [smem:[#allocation28_spill]] %s6785_s6 }
   0x8   :  { %6827 = sst [smem:[#allocation29_spill]] %s6786_s7 }
   0x9   :  { %6828 = sst [smem:[#allocation30_spill]] %s6787_s8 }
   0xa   :  { %6829 = sst [smem:[#allocation31_spill]] %s6788_s9 }
   0xb   :  { %6830 = sst [smem:[#allocation32_spill]] %s6789_s10 }
   0xc   :  { %6831 = sst [smem:[#allocation33_spill]] %s6793_s14 }
   0xd   :  { %6832 = sst [smem:[#allocation34_spill]] %s6794_s15 }
   0xe   :  { %6833 = sst [smem:[#allocation35_spill]] %s6797_s18 }
   0xf   :  { %6834 = sst [smem:[#allocation36_spill]] %s6798_s19 }
  0x10   :  { %6835 = sst [smem:[#allocation37_spill]] %s6799_s20 }
  0x11   :  { %6836 = sst [smem:[#allocation38_spill]] %s6800_s21 }
  0x12   :  { %6837 = sst [smem:[#allocation39_spill]] %s6801_s22 }
  0x13   :  { %27 = vsyncpa [#allocation4], 0 }
  0x14   :  { %29 = vsyncpa [#allocation4 + $0x1], 0  ;;  %s6044_s3 = smov 0   ;;  %s6046_s28 = smov 0  }
  0x15   :  { %s6048_s29 = smov 0   ;;  %s6050_s30 = smov 0  }
  0x16   :  { %s6052_s4 = smov 0   ;;  %s6054_s0 = smov 0  }
  0x17   :  { %s6056_s23 = smov 0   ;;  %s6058_s1 = smov 0  }
  0x18 LB: > { %6838 = sst [smem:[#allocation6_spill]] %s5891_s3  ;;  %s4829_s5 = sadd.s32 4294967295, %s5919_s1   ;;  %s5919_s1 = sphi %s6058_s1, %s35_s1   ;;  %s5915_s23 = sphi %s6056_s23, %s6897_s23   ;;  %s5911_s0 = sphi %s6054_s0, %s6896_s0   ;;  %s5907_s4 = sphi %s6052_s4, %s6895_s4   ;;  %s5903_s30 = sphi %s6050_s30, %s6894_s30   ;;  %s5899_s29 = sphi %s6048_s29, %s6893_s29   ;;  %s5895_s28 = sphi %s6046_s28, %s6899_s28   ;;  %s5891_s3 = sphi %s6044_s3, %s6898_s3  }
  0x19   : > { %6839 = sst [smem:[#allocation7_spill]] %s5899_s29  ;;  %s4830_s24 = sadd.s32 4294967294, %s5919_s1  }
  0x1a   : > { %6840 = sst [smem:[#allocation8_spill]] %s5903_s30  ;;  %s44_s6 = sadd.s32 1, %s5911_s0 }
  0x1b   : > { %6841 = sst [smem:[#allocation9_spill]] %s5907_s4  ;;  %p45_p0 = scmp.ge.s32.totalorder %s44_s6, 2 }
  0x1c   : > { %6842 = sst [smem:[#allocation10_spill]] %s5911_s0  ;;  %s47_s25 = sadd.s32 1, %s5915_s23 }
  0x1d   : > { %6843 = sst [smem:[#allocation11_spill]] %s5915_s23  ;;  %p611_p1 = scmp.ne.s32.totalorder %s5899_s29, %s5895_s28 }
  0x1e   : > { %6844 = sst [smem:[#allocation12_spill]] %s5919_s1  ;;  %p612_p2 = scmp.eq.s32.totalorder %s4829_s5, 3 }
  0x1f   : > { %s6901_s6 = smov (%p45_p0, %s44_s6), 0  ;;  %s6903_s25 = smov (!%p45_p0, %s47_s25), %s5915_s23 }
  0x20   : > { %6845 = sst [smem:[#allocation13_spill]] %s6901_s6  ;;  %p6093_p3 = por %p612_p2, %p611_p1 }
  0x21   : > { %p617_p4 = scmp.ne.s32.totalorder %s5895_s28, %s5891_s3  ;;  %p49_p5 = scmp.ge.s32.totalorder %s6903_s25, 2 }
  0x22   : > { %s6846_s26 = scalar_select %p6093_p3, 1, 0 }
  0x23   : > { %p618_p6 = scmp.eq.s32.totalorder %s4830_s24, 3  ;;  %p4833_p7 = scmp.ge.s32.totalorder %s5919_s1, 1 }
  0x24   : > { %6847 = sst [smem:[#allocation14_spill]] %s6846_s26  ;;  %p770_p8 = scmp.lt.s32.totalorder %s5919_s1, 5 }
  0x25   : > { %s6905_s25 = smov (%p49_p5, %s6903_s25), 0  ;;  %p6103_p9 = por %p618_p6, %p617_p4 }
  0x26   : > { %6848 = sst [smem:[#allocation15_spill]] %s6905_s25  ;;  %p771_p10 = pnand %p4833_p7, %p770_p8 }
  0x27   : > { %s6849_s2 = scalar_select %p6103_p9, 1, 0 }
  0x28   : > { %s598_s27 = ssub.s32 %s5915_s23, %s6905_s25  ;;  %s601_s5 = sadd.s32 1, %s5899_s29 }
  0x29   : > { %6850 = sst [smem:[#allocation16_spill]] %s6849_s2  ;;  %p599_p11 = scmp.eq.s32.totalorder %s598_s27, 0 }
  0x2a   : > { %774 = sbr.rel (%p771_p10) target bundleno = 5510 (0x1586), region = 108 }
  0x2b   : > { %s6111_s6 = scalar_select %p599_p11, %s5899_s29, %s601_s5  }
  0x2d   : > { %6851 = sst [smem:[#allocation17_spill]] %s6111_s6 }
  0x2f   : > { %p894_p12 = scmp.lt.s32.totalorder %s5907_s4, 1  ;;  %p898_p13 = scmp.lt.s32.totalorder %s5903_s30, 1 }
  0x30   : > { %s6852_s23 = sld [smem:[#allocation22_spill]] }
  0x31   : > { %s895_s0 = scalar_select %p894_p12, %s5907_s4, 1 }
  0x32   : > { %s6118_s3 = scalar_select %p898_p13, %s5903_s30, 1 }
  0x33   : > { %s4834_s27 = sshll.u32 %s895_s0, 3  ;;  %s6853_s1 = sld [smem:[#allocation26_spill]] }
  0x34   : > { %s5144_s29 = sshll.u32 %s6118_s3, 6  ;;  %s6854_s21 = sld [smem:[#allocation27_spill]] }
  0x35   : > { %s6855_s18 = sld [smem:[#allocation28_spill]]  ;;  %s5149_s25 = sshll.u32 %s6118_s3, 10 }
  0x36   : > { %s897_s6 = scalar_lea.vmem %s6852_s23, %s4834_s27  ;;  %s4841_s23 = sshll.u32 %s6118_s3, 2 }
  0x37   : > { %s6857_s7 = sld [smem:[#allocation29_spill]] }
  0x38   : > { %s6859_s8 = sld [smem:[#allocation30_spill]] }
  0x39   : > { %s6127_s22 = scalar_lea.vmem %s6853_s1, %s5144_s29  ;;  %s6860_s9 = sld [smem:[#allocation31_spill]] }
  0x3a   : > { %s6132_s20 = scalar_lea.vmem %s6854_s21, %s5144_s29  ;;  %s6862_s10 = sld [smem:[#allocation32_spill]] }
  0x3b   : > { %s6137_s0 = scalar_lea.vmem %s6855_s18, %s5144_s29  ;;  %s5147_s18 = sshll.u32 %s6118_s3, 4 }
  0x3c   : > { %6856 = sst [smem:[#allocation18_spill]] %s6137_s0  ;;  %s6188_s0 = scalar_lea.vmem %s6795_s16, %s5149_s25 }
  0x3d   : > { %s6143_s2 = scalar_lea.vmem %s6857_s7, %s4841_s23  ;;  %s6863_s15 = sld [smem:[#allocation34_spill]] }
  0x3e   : > { %6858 = sst [smem:[#allocation19_spill]] %s6143_s2  ;;  %s6148_s21 = scalar_lea.vmem %s6859_s8, %s4841_s23 }
  0x3f   : > { %s6153_s19 = scalar_lea.vmem %s6860_s9, %s4841_s23  ;;  %s5148_s23 = sshll.u32 %s6118_s3, 8 }
  0x40   : > { %6861 = sst [smem:[#allocation20_spill]] %s6153_s19  ;;  %s6159_s5 = scalar_lea.vmem %s6862_s10, %s5147_s18 }
  0x41   : > { %s6865_s14 = sld [smem:[#allocation33_spill]]  ;;  %s955_s2 = scalar_lea.vmem %s6796_s17, %s6118_s3 }
  0x42   : > { %s6866_s9 = sld [smem:[#allocation35_spill]] }
  0x43   : > { %s6177_s19 = scalar_lea.vmem %s6863_s15, %s5147_s18 }
  0x44   : > { %6864 = sst [smem:[#allocation21_spill]] %s6177_s19 }
  0x45   : > { %s6867_s19 = sld [smem:[#allocation36_spill]] }
  0x47   : > { %s6182_s10 = scalar_lea.vmem %s6865_s14, %s5148_s23  ;;  %s6868_s23 = sand.u32 1, %s5895_s28  }
  0x48   : > { %s958_s18 = scalar_lea.vmem %s6866_s9, %s6118_s3  ;;  %s6204_s30 = scalar_lea.vmem [#allocation3], %s6868_s23 }
  0x49   : > { %s6869_s14 = sld [smem:[#allocation8_spill]] }
  0x4b   : > { %s961_s29 = scalar_lea.vmem %s6867_s19, %s6118_s3 }
  0x4f   : > { %p4851_p0 = scmp.ne.s32.totalorder %s6869_s14, 0 }
  0x50   : > { %s6870_s27 = sld [smem:[#allocation24_spill]] (!%p4851_p0) }
  0x51   : > { %966 = sbr.rel (%p4851_p0) target bundleno = 290 (0x122), region = 112  ;;  %s6871_s24 = sld [smem:[#allocation25_spill]] (!%p4851_p0) }
  0x52   : > { %s6872_s1 = sld [smem:[#allocation23_spill]] (!%p4851_p0) }
  0x56   : > { %v5651_v0 = vld [vmem:[%s6870_s27] sm:$0xff]   ;;  %v5921_v1 = vmov 0.0   ;;  %vm5922_vm0 = vmmov 0   ;;  %vm984_vm1 = vcmask 130048   ;;  %vm1030_vm2 = vcmask 261120  }
  0x57   : > { %5391 = vmatprep.subr.bf16.mxu0 %v5921_v1  ;;  %v967_v2 = vld [vmem:[%s897_s6] sm:$0xff]  ;;  %5393 = vmatprep.mubr.msk.bf16.mxu0 %vm5922_vm0, %v5921_v1 }
  0x58   : > { %5392 = vmatpush3.bf16.msra.mxu0 %v5651_v0  ;;  %v968_v3 = vpack.c.bf16 %v967_v2, %v967_v2  ;;  %v4852_v4 = vld [vmem:[%s6871_s24] ss:$0 sm:$0xff] }
  0x59   : > { %v1028_v6 = vld [vmem:[%s6872_s1] sm:$0xff] }
  0x5b   : > { %5394 = vmatmul.mubr.msk.bf16.vlgmr.msra.gmra.mxu0 %vm984_vm1, %v968_v3 }
 0x11b   : > { %v1022_v5 = vpop.f32.mrf.mxu0 }
 0x11c   : > { %v1023_v7 = vadd.f32 %v4852_v4, %v1022_v5 }
 0x11d   : > { %v5395_v8 = vpop.f32.mrf.mxu0 }
 0x11e   : > { %v1029_v9 = vadd.f32 %v1028_v6, %v1023_v7 }
 0x11f   : > { %v1025_v10 = vpop.f32.mrf.mxu0 }
 0x120   : > { %1031 = vst.msk [vmem:[#allocation2] sm:$0xff] %vm1030_vm2, %v1029_v9 }
 0x121   : > { %v5396_v11 = vpop.f32.mrf.mxu0 }
 0x122 PF: > { %v5652_v12 = vld [vmem:[%s6132_s20 + $0x8] sm:$0xff]   ;;  %v5923_v13 = vmov 0.0   ;;  %v5654_v15 = vld [vmem:[%s6132_s20] sm:$0xff]   ;;  %vm5924_vm3 = vmmov 0   ;;  %vm1058_vm4 = vcmask 261120   ;;  %s6873_s6 = sld [smem:[#allocation19_spill]]  ;;  %s6876_s7 = scalar_lea.vmem %s6790_s11, %s6118_s3 }
 0x123   : > { %5405 = vmatprep.subr.bf16.mxu1 %v5923_v13  ;;  %5397 = vmatprep.subr.bf16.mxu0 %v5923_v13  ;;  %v5653_v14 = vld [vmem:[%s6127_s22 + $0x8] sm:$0xff]   ;;  %v5655_v16 = vld [vmem:[%s6127_s22] sm:$0xff]   ;;  %vm1230_vm5 = vcmask 64512   ;;  %s6874_s8 = sld [smem:[#allocation18_spill]]  ;;  %vm1294_vm6 = vcmask 1043456   ;;  %v5659_v61 = vld [vmem:[%s6127_s22 + $0x18] sm:$0xff]   ;;  %s6878_s27 = scalar_lea.vmem %s6792_s13, %s6118_s3 }
 0x124   : > { %5406 = vmatpush3.bf16.msra.mxu1 %v5652_v12  ;;  %5409 = vmatprep.mubr.msk.bf16.mxu1 %vm5924_vm3, %v5923_v13  ;;  %v4859_v19 = vld [vmem:[%s6148_s21] ss:$0 sm:$0xff]  ;;  %s6875_s9 = sld [smem:[#allocation20_spill]]  ;;  %v5661_v62 = vld [vmem:[%s6127_s22 + $0x10] sm:$0xff]   ;;  %v5658_v0 = vld [vmem:[%s6132_s20 + $0x18] sm:$0xff]  }
 0x125   : > { %5398 = vmatpush3.bf16.msra.mxu0 %v5653_v14  ;;  %5407 = vmatprep.subr.bf16.mxu1 %v5923_v13  ;;  %v1339_v55 = vld [vmem:[%s6159_s5] sm:$0xf]  ;;  %v5660_v4 = vld [vmem:[%s6132_s20 + $0x10] sm:$0xff]  }
 0x126   : > { %5399 = vmatprep.subr.bf16.mxu0 %v5923_v13  ;;  %5401 = vmatprep.mubr.msk.bf16.mxu0 %vm5924_vm3, %v5923_v13  ;;  %v1344_v56 = vsel %vm1294_vm6, %v1339_v55, 0  ;;  %v5667_v55 = vld [vmem:[%s6127_s22 + $0x20] sm:$0xff]  }
 0x127   : > { %v1032_v17 = vld [vmem:[#allocation2] sm:$0xff] }
 0x128   : > { %v6228_v18 = vpack.c.bf16 %v1032_v17, %v1032_v17  ;;  %5408 = vmatpush3.bf16.msra.mxu1 %v5654_v15  ;;  %v4855_v23 = vld [vmem:[%s6873_s6] ss:$0 sm:$0xff]  ;;  %v4885_v15 = vld [vmem:[%s6148_s21 + $0x1] ss:$0 sm:$0xff] }
 0x129   : > { %5400 = vmatpush3.bf16.msra.mxu0 %v5655_v16  ;;  %5421 = vmatprep.subr.bf16.mxu1 %v5923_v13  ;;  %v5656_v34 = vld [vmem:[%s6874_s8 + $0x8] sm:$0xff]   ;;  %v5657_v35 = vld [vmem:[%s6874_s8] sm:$0xff]  }
 0x12a   : > { %5413 = vmatprep.subr.bf16.mxu0 %v5923_v13  ;;  %v4863_v47 = vld [vmem:[%s6875_s9] ss:$0 sm:$0xff] }
 0x12b   : > { %5410 = vmatmul.mubr.msk.bf16.vlgmr.msra.gmra.mxu1 %vm1058_vm4, %v6228_v18 }
 0x12c   : > { %5402 = vmatmul.mubr.msk.bf16.vlgmr.msra.gmra.mxu0 %vm1058_vm4, %v6228_v18  ;;  %5423 = vmatprep.mubr.msk.bf16.mxu1 %vm5924_vm3, %v5923_v13 }
 0x12d   : > { %5417 = vmatprep.mubr.msk.bf16.mxu0 %vm5924_vm3, %v5923_v13  ;;  %5414 = vmatpush3.bf16.msra.mxu0 %v5656_v34 }
 0x12e   : > { %5415 = vmatprep.subr.bf16.mxu0 %v5923_v13 }
 0x131   : > { %5416 = vmatpush3.bf16.msra.mxu0 %v5657_v35 }
 0x132   : > { %5427 = vmatprep.subr.bf16.mxu0 %v5923_v13 }
 0x134   : > { %5418 = vmatmul.mubr.msk.bf16.vlgmr.msra.gmra.mxu0 %vm1058_vm4, %v6228_v18 }
 0x135   : > { %5429 = vmatprep.mubr.msk.bf16.mxu0 %vm5924_vm3, %v5923_v13 }
 0x1eb   : > { %v1159_v20 = vpop.f32.mrf.mxu1 }
 0x1ec   : > { %v1160_v21 = vadd.f32 %v4859_v19, %v1159_v20  ;;  %v1096_v22 = vpop.f32.mrf.mxu0  ;;  %v4876_v19 = vld [vmem:[%s6873_s6 + $0x1] ss:$0 sm:$0xff] }
 0x1ed   : > { %v5411_v24 = vpop.f32.mrf.mxu1  ;;  %v1097_v29 = vadd.f32 %v4855_v23, %v1096_v22 }
 0x1ee   : > { %v1229_v25 = vpack.c.bf16 %v1160_v21, %v1160_v21  ;;  %v5403_v26 = vpop.f32.mrf.mxu0 }
 0x1ef   : > { %v1162_v27 = vpop.f32.mrf.mxu1  ;;  %v1228_v33 = vpack.c.bf16 %v1097_v29, %v1097_v29 }
 0x1f0   : > { %v1235_v28 = vsel %vm1230_vm5, %v1229_v25, 0  ;;  %v1099_v30 = vpop.f32.mrf.mxu0  ;;  %v5662_v27 = vld [vmem:[%s6874_s8 + $0x18] sm:$0xff]  }
 0x1f1   : > { %v5412_v31 = vpop.f32.mrf.mxu1  ;;  %5422 = vmatpush3.bf16.xpose.msra.mxu1 %v1235_v28  ;;  %v5663_v28 = vld [vmem:[%s6874_s8 + $0x10] sm:$0xff]  }
 0x1f2   : > { %v5404_v32 = vpop.f32.mrf.mxu0  ;;  %5433 = vmatprep.subr.bf16.mxu1 %v5923_v13 }
 0x1f4   : > { %v1222_v48 = vpop.f32.mrf.mxu0 }
 0x1f5   : > { %v1223_v49 = vadd.f32 %v4863_v47, %v1222_v48  ;;  %v4900_v48 = vld [vmem:[%s6159_s5 + $0x4] sm:$0xf] }
 0x1f6   : > { %v5419_v50 = vpop.f32.mrf.mxu0 }
 0x1f7   : > { %v1290_v51 = vpack.c.bf16 %v1223_v49, %v1223_v49  ;;  %v1703_v49 = vsel %vm1294_vm6, %v4900_v48, 0 }
 0x1f8   : > { %5424 = vmatmul.mubr.msk.bf16.vlgmr.msra.gmra.mxu1 %vm1230_vm5, %v1228_v33  ;;  %v1225_v52 = vpop.f32.mrf.mxu0 }
 0x1f9   : > { %5435 = vmatprep.mubr.msk.bf16.mxu1 %vm5924_vm3, %v5923_v13  ;;  %v1296_v53 = vsel %vm1294_vm6, %v1290_v51, 0  ;;  %5434 = vmatpush3.bf16.msra.mxu1 %v1344_v56 }
 0x1fa   : > { %v5420_v54 = vpop.f32.mrf.mxu0  ;;  %5428 = vmatpush3.bf16.msra.mxu0 %v1296_v53  ;;  %5447 = vmatprep.subr.bf16.mxu1 %v5923_v13 }
 0x1fb   : > { %5439 = vmatprep.subr.bf16.mxu0 %v5923_v13  ;;  %v5665_v54 = vld [vmem:[%s6127_s22 + $0x28] sm:$0xff]  }
 0x2b8   : > { %v1271_v36 = vpop.f32.mrf.mxu1 }
 0x2b9   : > { %v1277_v37 = vmul.f32 0.35355338, %v1271_v36 }
 0x2ba   : > { %v5425_v38 = vpop.f32.mrf.mxu1 }
 0x2bb   : > { %v1278_v39 = vsel %vm1230_vm5, %v1277_v37, -inf }
 0x2bc   : > { %1279 = vmax.xlane.f32.xlu0 %v1278_v39  ;;  %v1274_v40 = vpop.f32.mrf.mxu1 }
 0x2bd   : > { %v4894_v40 = vld [vmem:[%s6875_s9 + $0x1] ss:$0 sm:$0xff] }
 0x2be   : > { %v5426_v41 = vpop.f32.mrf.mxu1 }
 0x345   : > { %v1280_v42 = vpop.xlane.xlu0 %1279 }
 0x346   : > { %v1281_v43 = vsub.f32 %v1277_v37, %v1280_v42 }
 0x348   : > { %v1282_v44 = vmul.f32 1.442695, %v1281_v43 }
 0x34a   : > { %5804 = vpow2.f32 %v1282_v44 }
 0x357   : > { %v5805_v45 = vpop.eup %5804 }
 0x358   : > { %v1284_v46 = vsel %vm1230_vm5, %v5805_v45, 0.0 }
 0x359   : > { %1285 = vadd.xlane.f32.xlu0 %v1284_v46 }
 0x3e2   : > { %v1286_v57 = vpop.xlane.xlu0 %1285 }
 0x3e3   : > { %5806 = vrcp.f32 %v1286_v57  ;;  %v5664_v57 = vld [vmem:[%s6132_s20 + $0x28] sm:$0xff]  }
 0x3f0   : > { %v5807_v58 = vpop.eup %5806 }
 0x3f1   : > { %v1288_v59 = vmul.f32 %v5807_v58, %v5805_v45 }
 0x3f3   : > { %v1289_v60 = vpack.c.bf16 %v1288_v59, %v1288_v59 }
 0x3f5   : > { %5430 = vmatmul.mubr.msk.bf16.vlgmr.msra.gmra.mxu0 %vm1230_vm5, %v1289_v60 }
 0x3f6   : > { %5443 = vmatprep.mubr.msk.bf16.mxu0 %vm5924_vm3, %v5923_v13  ;;  %5440 = vmatpush3.bf16.msra.mxu0 %v5659_v61  ;;  %v5666_v61 = vld [vmem:[%s6132_s20 + $0x20] sm:$0xff]  }
 0x3f7   : > { %5441 = vmatprep.subr.bf16.mxu0 %v5923_v13 }
 0x3fa   : > { %5442 = vmatpush3.bf16.msra.mxu0 %v5661_v62 }
 0x3fb   : > { %5455 = vmatprep.subr.bf16.mxu0 %v5923_v13 }
 0x3fd   : > { %5444 = vmatmul.mubr.msk.bf16.vlgmr.msra.gmra.mxu0 %vm1058_vm4, %v6228_v18 }
 0x3fe   : > { %5459 = vmatprep.mubr.msk.bf16.mxu0 %vm5924_vm3, %v5923_v13  ;;  %5456 = vmatpush3.bf16.msra.mxu0 %v5662_v27 }
 0x3ff   : > { %5457 = vmatprep.subr.bf16.mxu0 %v5923_v13 }
 0x402   : > { %5458 = vmatpush3.bf16.msra.mxu0 %v5663_v28 }
 0x403   : > { %5469 = vmatprep.subr.bf16.mxu0 %v5923_v13 }
 0x405   : > { %5460 = vmatmul.mubr.msk.bf16.vlgmr.msra.gmra.mxu0 %vm1058_vm4, %v6228_v18 }
 0x406   : > { %5471 = vmatprep.mubr.msk.bf16.mxu0 %vm5924_vm3, %v5923_v13 }
 0x4b5   : > { %v1332_v63 = vpop.f32.mrf.mxu0 }
 0x4b6   : > { %v1338_v1 = vpack.c.bf16 %v1332_v63, %v1332_v63 }
 0x4b7   : > { %v5431_v2 = vpop.f32.mrf.mxu0 }
 0x4b8   : > { %5436 = vmatmul.mubr.msk.bf16.vlgmr.msra.gmra.mxu1 %vm1230_vm5, %v1338_v1 }
 0x4b9   : > { %v1335_v3 = vpop.f32.mrf.mxu0  ;;  %5448 = vmatpush3.bf16.msra.mxu1 %v5658_v0  ;;  %5451 = vmatprep.mubr.msk.bf16.mxu1 %vm5924_vm3, %v5923_v13 }
 0x4ba   : > { %5449 = vmatprep.subr.bf16.mxu1 %v5923_v13  ;;  %v4870_v3 = vld [vmem:[%s6876_s7] ss:$0 sm:$0xff] }
 0x4bb   : > { %v5432_v5 = vpop.f32.mrf.mxu0 }
 0x4bd   : > { %5450 = vmatpush3.bf16.msra.mxu1 %v5660_v4  ;;  %v1452_v6 = vpop.f32.mrf.mxu0 }
 0x4be   : > { %5463 = vmatprep.subr.bf16.mxu1 %v5923_v13  ;;  %v1453_v24 = vadd.f32 %v4876_v19, %v1452_v6 }
 0x4bf   : > { %v5445_v7 = vpop.f32.mrf.mxu0 }
 0x4c0   : > { %5452 = vmatmul.mubr.msk.bf16.vlgmr.msra.gmra.mxu1 %vm1058_vm4, %v6228_v18  ;;  %v1588_v26 = vpack.c.bf16 %v1453_v24, %v1453_v24  ;;  %v5669_v24 = vld [vmem:[%s6874_s8 + $0x20] sm:$0xff]  }
 0x4c1   : > { %5465 = vmatprep.mubr.msk.bf16.mxu1 %vm5924_vm3, %v5923_v13  ;;  %v1455_v8 = vpop.f32.mrf.mxu0 }
 0x4c3   : > { %v5446_v9 = vpop.f32.mrf.mxu0 }
 0x4c5   : > { %v1582_v41 = vpop.f32.mrf.mxu0 }
 0x4c6   : > { %v1583_v42 = vadd.f32 %v4894_v40, %v1582_v41 }
 0x4c7   : > { %v5461_v43 = vpop.f32.mrf.mxu0 }
 0x4c8   : > { %v1649_v44 = vpack.c.bf16 %v1583_v42, %v1583_v42 }
 0x4c9   : > { %v1585_v45 = vpop.f32.mrf.mxu0 }
 0x4ca   : > { %v1654_v46 = vsel %vm1294_vm6, %v1649_v44, 0  ;;  %v4931_v44 = vld [vmem:[%s6159_s5 + $0x8] sm:$0xf] }
 0x4cb   : > { %v5462_v47 = vpop.f32.mrf.mxu0  ;;  %5470 = vmatpush3.bf16.msra.mxu0 %v1654_v46  ;;  %v2056_v45 = vsel %vm1294_vm6, %v4931_v44, 0 }
 0x4cc   : > { %5481 = vmatprep.subr.bf16.mxu0 %v5923_v13 }
 0x578   : > { %v6285_v10 = vpop.f32.mrf.mxu1 }
 0x579   : > { %v1392_v4 = vadd.f32 %v4870_v3, %v6285_v10 }
 0x57a   : > { %v5437_v11 = vpop.f32.mrf.mxu1 }
 0x57b   : > { %v4916_v11 = vld [vmem:[%s6148_s21 + $0x2] ss:$0 sm:$0xff] }
 0x57c   : > { %v1383_v12 = vpop.f32.mrf.mxu1 }
 0x57e   : > { %v5438_v14 = vpop.f32.mrf.mxu1 }
 0x580   : > { %v1517_v16 = vpop.f32.mrf.mxu1 }
 0x581   : > { %v1518_v17 = vadd.f32 %v4885_v15, %v1517_v16  ;;  %v4907_v15 = vld [vmem:[%s6873_s6 + $0x2] ss:$0 sm:$0xff] }
 0x582   : > { %v5453_v20 = vpop.f32.mrf.mxu1 }
 0x583   : > { %v1589_v21 = vpack.c.bf16 %v1518_v17, %v1518_v17 }
 0x584   : > { %v1520_v22 = vpop.f32.mrf.mxu1 }
 0x585   : > { %v1594_v23 = vsel %vm1230_vm5, %v1589_v21, 0 }
 0x586   : > { %v5454_v25 = vpop.f32.mrf.mxu1  ;;  %5464 = vmatpush3.bf16.xpose.msra.mxu1 %v1594_v23  ;;  %v5668_v23 = vld [vmem:[%s6874_s8 + $0x28] sm:$0xff]  }
 0x587   : > { %5475 = vmatprep.subr.bf16.mxu1 %v5923_v13 }
 0x58d   : > { %5466 = vmatmul.mubr.msk.bf16.vlgmr.msra.gmra.mxu1 %vm1230_vm5, %v1588_v26 }
 0x58e   : > { %5477 = vmatprep.mubr.msk.bf16.mxu1 %vm5924_vm3, %v5923_v13  ;;  %5476 = vmatpush3.bf16.msra.mxu1 %v1703_v49 }
 0x58f   : > { %5489 = vmatprep.subr.bf16.mxu1 %v5923_v13 }
 0x64d   : > { %v1630_v29 = vpop.f32.mrf.mxu1 }
 0x64e   : > { %v1636_v30 = vmul.f32 0.35355338, %v1630_v29 }
 0x64f   : > { %v5467_v31 = vpop.f32.mrf.mxu1 }
 0x650   : > { %v1637_v32 = vsel %vm1230_vm5, %v1636_v30, -inf }
 0x651   : > { %1638 = vmax.xlane.f32.xlu1 %v1637_v32  ;;  %v1633_v33 = vpop.f32.mrf.mxu1 }
 0x653   : > { %v5468_v34 = vpop.f32.mrf.mxu1 }
 0x6da   : > { %v1639_v35 = vpop.xlane.xlu1 %1638 }
 0x6db   : > { %v1640_v36 = vsub.f32 %v1636_v30, %v1639_v35 }
 0x6dd   : > { %v1641_v37 = vmul.f32 1.442695, %v1640_v36  ;;  %v4925_v36 = vld [vmem:[%s6875_s9 + $0x2] ss:$0 sm:$0xff] }
 0x6df   : > { %5808 = vpow2.f32 %v1641_v37 }
 0x6ec   : > { %v5809_v38 = vpop.eup %5808 }
 0x6ed   : > { %v1643_v39 = vsel %vm1230_vm5, %v5809_v38, 0.0 }
 0x6ee   : > { %1644 = vadd.xlane.f32.xlu1 %v1643_v39 }
 0x777   : > { %v1645_v50 = vpop.xlane.xlu1 %1644 }
 0x778   : > { %5810 = vrcp.f32 %v1645_v50  ;;  %v5671_v50 = vld [vmem:[%s6127_s22 + $0x38] sm:$0xff]  }
 0x785   : > { %v5811_v51 = vpop.eup %5810 }
 0x786   : > { %v1647_v52 = vmul.f32 %v5811_v51, %v5809_v38  ;;  %v5673_v51 = vld [vmem:[%s6127_s22 + $0x30] sm:$0xff]  }
 0x788   : > { %v1648_v53 = vpack.c.bf16 %v1647_v52, %v1647_v52 }
 0x78a   : > { %5472 = vmatmul.mubr.msk.bf16.vlgmr.msra.gmra.mxu0 %vm1230_vm5, %v1648_v53  ;;  %v5670_v53 = vld [vmem:[%s6132_s20 + $0x38] sm:$0xff]  }
 0x78b   : > { %5485 = vmatprep.mubr.msk.bf16.mxu0 %vm5924_vm3, %v5923_v13  ;;  %5482 = vmatpush3.bf16.msra.mxu0 %v5665_v54 }
 0x78c   : > { %5483 = vmatprep.subr.bf16.mxu0 %v5923_v13 }
 0x78f   : > { %5484 = vmatpush3.bf16.msra.mxu0 %v5667_v55 }
 0x790   : > { %5497 = vmatprep.subr.bf16.mxu0 %v5923_v13 }
 0x792   : > { %5486 = vmatmul.mubr.msk.bf16.vlgmr.msra.gmra.mxu0 %vm1058_vm4, %v6228_v18 }
 0x793   : > { %5501 = vmatprep.mubr.msk.bf16.mxu0 %vm5924_vm3, %v5923_v13  ;;  %5498 = vmatpush3.bf16.msra.mxu0 %v5668_v23 }
 0x794   : > { %5499 = vmatprep.subr.bf16.mxu0 %v5923_v13 }
 0x797   : > { %5500 = vmatpush3.bf16.msra.mxu0 %v5669_v24 }
 0x798   : > { %5511 = vmatprep.subr.bf16.mxu0 %v5923_v13 }
 0x79a   : > { %5502 = vmatmul.mubr.msk.bf16.vlgmr.msra.gmra.mxu0 %vm1058_vm4, %v6228_v18 }
 0x79b   : > { %5513 = vmatprep.mubr.msk.bf16.mxu0 %vm5924_vm3, %v5923_v13 }
 0x84a   : > { %v1690_v56 = vpop.f32.mrf.mxu0 }
 0x84b   : > { %v1696_v58 = vpack.c.bf16 %v1690_v56, %v1690_v56 }
 0x84c   : > { %v5473_v59 = vpop.f32.mrf.mxu0 }
 0x84d   : > { %5478 = vmatmul.mubr.msk.bf16.vlgmr.msra.gmra.mxu1 %vm1230_vm5, %v1696_v58 }
 0x84e   : > { %v1693_v60 = vpop.f32.mrf.mxu0  ;;  %5490 = vmatpush3.bf16.msra.mxu1 %v5664_v57  ;;  %5493 = vmatprep.mubr.msk.bf16.mxu1 %vm5924_vm3, %v5923_v13  ;;  %v5672_v57 = vld [vmem:[%s6132_s20 + $0x30] sm:$0xff]  }
 0x84f   : > { %5491 = vmatprep.subr.bf16.mxu1 %v5923_v13 }
 0x850   : > { %v5474_v62 = vpop.f32.mrf.mxu0 }
 0x852   : > { %5492 = vmatpush3.bf16.msra.mxu1 %v5666_v61  ;;  %v1805_v63 = vpop.f32.mrf.mxu0 }
 0x853   : > { %5505 = vmatprep.subr.bf16.mxu1 %v5923_v13  ;;  %v1806_v21 = vadd.f32 %v4907_v15, %v1805_v63 }
 0x854   : > { %v5487_v0 = vpop.f32.mrf.mxu0 }
 0x855   : > { %5494 = vmatmul.mubr.msk.bf16.vlgmr.msra.gmra.mxu1 %vm1058_vm4, %v6228_v18  ;;  %v1941_v10 = vpack.c.bf16 %v1806_v21, %v1806_v21 }
 0x856   : > { %5507 = vmatprep.mubr.msk.bf16.mxu1 %vm5924_vm3, %v5923_v13  ;;  %v1808_v1 = vpop.f32.mrf.mxu0 }
 0x858   : > { %v5488_v2 = vpop.f32.mrf.mxu0 }
 0x85a   : > { %v1935_v37 = vpop.f32.mrf.mxu0 }
 0x85b   : > { %v1936_v38 = vadd.f32 %v4925_v36, %v1935_v37  ;;  %v4962_v36 = vld [vmem:[%s6159_s5 + $0xc] sm:$0xf] }
 0x85c   : > { %v5503_v39 = vpop.f32.mrf.mxu0  ;;  %v2409_v37 = vsel %vm1294_vm6, %v4962_v36, 0 }
 0x85d   : > { %v2002_v40 = vpack.c.bf16 %v1936_v38, %v1936_v38 }
 0x85e   : > { %v1938_v41 = vpop.f32.mrf.mxu0 }
 0x85f   : > { %v2007_v42 = vsel %vm1294_vm6, %v2002_v40, 0 }
 0x860   : > { %v5504_v43 = vpop.f32.mrf.mxu0  ;;  %5512 = vmatpush3.bf16.msra.mxu0 %v2007_v42 }
 0x861   : > { %5523 = vmatprep.subr.bf16.mxu0 %v5923_v13 }
 0x90d   : > { %v1739_v5 = vpop.f32.mrf.mxu1 }
 0x90e   : > { %v6338_v6 = vadd.f32 %v1739_v5, %v1392_v4  ;;  %v4947_v4 = vld [vmem:[%s6148_s21 + $0x3] ss:$0 sm:$0xff]  ;;  %s6877_s21 = scalar_lea.vmem %s6791_s12, %s6118_s3 }
 0x90f   : > { %v5479_v7 = vpop.f32.mrf.mxu1 }
 0x911   : > { %v1742_v8 = vpop.f32.mrf.mxu1 }
 0x913   : > { %v5480_v9 = vpop.f32.mrf.mxu1 }
 0x914   : > { %v4938_v9 = vld [vmem:[%s6873_s6 + $0x3] ss:$0 sm:$0xff]  ;;  %s6882_s6 = sld [smem:[#allocation8_spill]] }
 0x915   : > { %v1870_v12 = vpop.f32.mrf.mxu1 }
 0x916   : > { %v1871_v14 = vadd.f32 %v4916_v11, %v1870_v12 }
 0x917   : > { %v5495_v16 = vpop.f32.mrf.mxu1 }
 0x918   : > { %v1942_v17 = vpack.c.bf16 %v1871_v14, %v1871_v14 }
 0x919   : > { %v1873_v19 = vpop.f32.mrf.mxu1 }
 0x91a   : > { %v1947_v20 = vsel %vm1230_vm5, %v1942_v17, 0  ;;  %v5674_v17 = vld [vmem:[%s6874_s8 + $0x38] sm:$0xff]   ;;  %v5675_v19 = vld [vmem:[%s6874_s8 + $0x30] sm:$0xff]   ;;  %p5137_p1 = scmp.ne.s32.totalorder %s6882_s6, 1 }
 0x91b   : > { %v5496_v22 = vpop.f32.mrf.mxu1  ;;  %5506 = vmatpush3.bf16.xpose.msra.mxu1 %v1947_v20  ;;  %s6883_s26 = sld [smem:[#allocation37_spill]] (!%p5137_p1) }
 0x91c   : > { %5517 = vmatprep.subr.bf16.mxu1 %v5923_v13  ;;  %s6884_s7 = sld [smem:[#allocation38_spill]] (!%p5137_p1) }
 0x922   : > { %5508 = vmatmul.mubr.msk.bf16.vlgmr.msra.gmra.mxu1 %vm1230_vm5, %v1941_v10 }
 0x923   : > { %5519 = vmatprep.mubr.msk.bf16.mxu1 %vm5924_vm3, %v5923_v13  ;;  %5518 = vmatpush3.bf16.msra.mxu1 %v2056_v45 }
 0x924   : > { %5531 = vmatprep.subr.bf16.mxu1 %v5923_v13 }
 0x9e2   : > { %v1983_v25 = vpop.f32.mrf.mxu1 }
 0x9e3   : > { %v1989_v26 = vmul.f32 0.35355338, %v1983_v25 }
 0x9e4   : > { %v5509_v27 = vpop.f32.mrf.mxu1 }
 0x9e5   : > { %v1990_v28 = vsel %vm1230_vm5, %v1989_v26, -inf }
 0x9e6   : > { %1991 = vmax.xlane.f32.xlu0 %v1990_v28  ;;  %v1986_v29 = vpop.f32.mrf.mxu1 }
 0x9e7   : > { %v4956_v29 = vld [vmem:[%s6875_s9 + $0x3] ss:$0 sm:$0xff] }
 0x9e8   : > { %v5510_v30 = vpop.f32.mrf.mxu1 }
 0xa6f   : > { %v1992_v31 = vpop.xlane.xlu0 %1991 }
 0xa70   : > { %v1993_v32 = vsub.f32 %v1989_v26, %v1992_v31 }
 0xa72   : > { %v1994_v33 = vmul.f32 1.442695, %v1993_v32 }
 0xa74   : > { %5812 = vpow2.f32 %v1994_v33 }
 0xa81   : > { %v5813_v34 = vpop.eup %5812 }
 0xa82   : > { %v1996_v35 = vsel %vm1230_vm5, %v5813_v34, 0.0 }
 0xa83   : > { %1997 = vadd.xlane.f32.xlu1 %v1996_v35 }
 0xb0c   : > { %v1998_v46 = vpop.xlane.xlu1 %1997 }
 0xb0d   : > { %5814 = vrcp.f32 %v1998_v46 }
 0xb1a   : > { %v5815_v47 = vpop.eup %5814 }
 0xb1b   : > { %v2000_v48 = vmul.f32 %v5815_v47, %v5813_v34 }
 0xb1d   : > { %v2001_v49 = vpack.c.bf16 %v2000_v48, %v2000_v48 }
 0xb1f   : > { %5514 = vmatmul.mubr.msk.bf16.vlgmr.msra.gmra.mxu0 %vm1230_vm5, %v2001_v49 }
 0xb20   : > { %5527 = vmatprep.mubr.msk.bf16.mxu0 %vm5924_vm3, %v5923_v13  ;;  %5524 = vmatpush3.bf16.msra.mxu0 %v5671_v50  ;;  %v5824_v50 = vld [vmem:[#allocation2] sm:$0xff] }
 0xb21   : > { %5525 = vmatprep.subr.bf16.mxu0 %v5923_v13 }
 0xb24   : > { %5526 = vmatpush3.bf16.msra.mxu0 %v5673_v51 }
 0xb25   : > { %5539 = vmatprep.subr.bf16.mxu0 %v5923_v13 }
 0xb27   : > { %5528 = vmatmul.mubr.msk.bf16.vlgmr.msra.gmra.mxu0 %vm1058_vm4, %v6228_v18 }
 0xb28   : > { %5543 = vmatprep.mubr.msk.bf16.mxu0 %vm5924_vm3, %v5923_v13  ;;  %5540 = vmatpush3.bf16.msra.mxu0 %v5674_v17 }
 0xb29   : > { %5541 = vmatprep.subr.bf16.mxu0 %v5923_v13 }
 0xb2c   : > { %5542 = vmatpush3.bf16.msra.mxu0 %v5675_v19  ;;  %v2511_v19 = vld [vmem:[%s6182_s10 + $0xd8] sm:$0xff] }
 0xb2d   : > { %5553 = vmatprep.subr.bf16.mxu0 %v5923_v13 }
 0xb2f   : > { %5544 = vmatmul.mubr.msk.bf16.vlgmr.msra.gmra.mxu0 %vm1058_vm4, %v6228_v18 }
 0xb30   : > { %5555 = vmatprep.mubr.msk.bf16.mxu0 %vm5924_vm3, %v5923_v13 }
 0xbdf   : > { %v2043_v52 = vpop.f32.mrf.mxu0 }
 0xbe0   : > { %v2049_v54 = vpack.c.bf16 %v2043_v52, %v2043_v52 }
 0xbe1   : > { %v5515_v55 = vpop.f32.mrf.mxu0 }
 0xbe2   : > { %5520 = vmatmul.mubr.msk.bf16.vlgmr.msra.gmra.mxu1 %vm1230_vm5, %v2049_v54 }
 0xbe3   : > { %v2046_v56 = vpop.f32.mrf.mxu0  ;;  %5532 = vmatpush3.bf16.msra.mxu1 %v5670_v53  ;;  %5535 = vmatprep.mubr.msk.bf16.mxu1 %vm5924_vm3, %v5923_v13 }
 0xbe4   : > { %5533 = vmatprep.subr.bf16.mxu1 %v5923_v13 }
 0xbe5   : > { %v5516_v58 = vpop.f32.mrf.mxu0 }
 0xbe7   : > { %5534 = vmatpush3.bf16.msra.mxu1 %v5672_v57  ;;  %v2158_v59 = vpop.f32.mrf.mxu0 }
 0xbe8   : > { %5547 = vmatprep.subr.bf16.mxu1 %v5923_v13  ;;  %v2159_v15 = vadd.f32 %v4938_v9, %v2158_v59  ;;  %v2493_v9 = vld [vmem:[%s6182_s10 + $0x48] sm:$0xff] }
 0xbe9   : > { %v5529_v60 = vpop.f32.mrf.mxu0 }
 0xbea   : > { %5536 = vmatmul.mubr.msk.bf16.vlgmr.msra.gmra.mxu1 %vm1058_vm4, %v6228_v18  ;;  %v2500_v60 = vld [vmem:[%s6182_s10 + $0x80] sm:$0xff] }
 0xbeb   : > { %5549 = vmatprep.mubr.msk.bf16.mxu1 %vm5924_vm3, %v5923_v13  ;;  %v2161_v61 = vpop.f32.mrf.mxu0 }
 0xbec   : > { %v2508_v61 = vld [vmem:[%s6182_s10 + $0xc0] sm:$0xff] }
 0xbed   : > { %v5530_v62 = vpop.f32.mrf.mxu0 }
 0xbee   : > { %v2501_v62 = vld [vmem:[%s6182_s10 + $0x88] sm:$0xff] }
 0xbef   : > { %v2288_v30 = vpop.f32.mrf.mxu0 }
 0xbf1   : > { %v5545_v31 = vpop.f32.mrf.mxu0 }
 0xbf2   : > { %v2487_v31 = vld [vmem:[%s6182_s10 + $0x18] sm:$0xff] }
 0xbf3   : > { %v2291_v33 = vpop.f32.mrf.mxu0 }
 0xbf5   : > { %v5546_v35 = vpop.f32.mrf.mxu0 }
 0xca2   : > { %v2092_v63 = vpop.f32.mrf.mxu1 }
 0xca3   : > { %v6386_v0 = vadd.f32 %v2092_v63, %v6338_v6  ;;  %v2294_v6 = vpack.c.bf16 %v2159_v15, %v2159_v15  ;;  %v4983_v63 = vcombine.high %v2500_v60, %v2508_v61  ;;  %v2502_v15 = vld [vmem:[%s6182_s10 + $0x90] sm:$0xff] }
 0xca4   : > { %v5521_v1 = vpop.f32.mrf.mxu1 }
 0xca5   : > { %v4982_v1 = vcombine.low %v2500_v60, %v2508_v61  ;;  %v2490_v61 = vld [vmem:[%s6182_s10 + $0x30] sm:$0xff] }
 0xca6   : > { %v2095_v2 = vpop.f32.mrf.mxu1 }
 0xca8   : > { %v5522_v3 = vpop.f32.mrf.mxu1 }
 0xcaa   : > { %v2223_v5 = vpop.f32.mrf.mxu1 }
 0xcab   : > { %v2224_v7 = vadd.f32 %v4947_v4, %v2223_v5  ;;  %v2484_v4 = vld [vmem:[%s6182_s10] sm:$0xff] }
 0xcac   : > { %v5537_v8 = vpop.f32.mrf.mxu1  ;;  %v2492_v5 = vld [vmem:[%s6182_s10 + $0x40] sm:$0xff] }
 0xcad   : > { %v2295_v11 = vpack.c.bf16 %v2224_v7, %v2224_v7  ;;  %v2485_v7 = vld [vmem:[%s6182_s10 + $0x8] sm:$0xff]  ;;  %v4967_v8 = vcombine.high %v2484_v4, %v2492_v5 }
 0xcae   : > { %v2226_v12 = vpop.f32.mrf.mxu1 }
 0xcaf   : > { %v2300_v14 = vsel %vm1230_vm5, %v2295_v11, 0  ;;  %v4966_v11 = vcombine.low %v2484_v4, %v2492_v5  ;;  %v4968_v12 = vcombine.low %v2485_v7, %v2493_v9 }
 0xcb0   : > { %v5538_v16 = vpop.f32.mrf.mxu1  ;;  %5548 = vmatpush3.bf16.xpose.msra.mxu1 %v2300_v14  ;;  %v4969_v14 = vcombine.high %v2485_v7, %v2493_v9  ;;  %v5677_v9 = vld [vmem:[%s6188_s0 + $0xf8] sm:$0xff]  }
 0xcb1   : > { %5559 = vmatprep.subr.bf16.mxu1 %v5923_v13  ;;  %v2510_v16 = vld [vmem:[%s6182_s10 + $0xd0] sm:$0xff] }
 0xcb2   : > { %v4987_v17 = vcombine.high %v2502_v15, %v2510_v16 }
 0xcb7   : > { %5550 = vmatmul.mubr.msk.bf16.vlgmr.msra.gmra.mxu1 %vm1230_vm5, %v2294_v6  ;;  %v2503_v6 = vld [vmem:[%s6182_s10 + $0x98] sm:$0xff] }
 0xcb8   : > { %5561 = vmatprep.mubr.msk.bf16.mxu1 %vm5924_vm3, %v5923_v13  ;;  %v2289_v13 = vadd.f32 %v4956_v29, %v2288_v30  ;;  %5560 = vmatpush3.bf16.msra.mxu1 %v2409_v37  ;;  %v2486_v30 = vld [vmem:[%s6182_s10 + $0x10] sm:$0xff]  ;;  %v2504_v37 = vld [vmem:[%s6182_s10 + $0xa0] sm:$0xff] }
 0xcba   : > { %v2355_v32 = vpack.c.bf16 %v2289_v13, %v2289_v13  ;;  %v2494_v13 = vld [vmem:[%s6182_s10 + $0x50] sm:$0xff] }
 0xcbb   : > { %v4971_v35 = vcombine.high %v2486_v30, %v2494_v13 }
 0xcbc   : > { %v2360_v34 = vsel %vm1294_vm6, %v2355_v32, 0  ;;  %v2495_v32 = vld [vmem:[%s6182_s10 + $0x58] sm:$0xff] }
 0xcbd   : > { %5554 = vmatpush3.bf16.msra.mxu0 %v2360_v34  ;;  %v4973_v36 = vcombine.high %v2487_v31, %v2495_v32 }
 0xcbe   : > { %2775 = vmatprep.subr.bf16.mxu0 %v4983_v63  ;;  %v2491_v63 = vld [vmem:[%s6182_s10 + $0x38] sm:$0xff] }
 0xd77   : > { %v2336_v20 = vpop.f32.mrf.mxu1 }
 0xd78   : > { %v2342_v21 = vmul.f32 0.35355338, %v2336_v20  ;;  %v5925_v20 = vmov 0  }
 0xd79   : > { %v5551_v22 = vpop.f32.mrf.mxu1 }
 0xd7a   : > { %v2343_v10 = vsel %vm1230_vm5, %v2342_v21, -inf  ;;  %v4988_v22 = vcombine.low %v2503_v6, %v2511_v19 }
 0xd7b   : > { %2344 = vmax.xlane.f32.xlu0 %v2343_v10  ;;  %v2339_v23 = vpop.f32.mrf.mxu1  ;;  %v4989_v10 = vcombine.high %v2503_v6, %v2511_v19  ;;  %v5683_v6 = vld [vmem:[%s6188_s0 + $0xb0] sm:$0xff]   ;;  %v5685_v19 = vld [vmem:[%s6188_s0 + $0xe8] sm:$0xff]  }
 0xd7d   : > { %v5552_v24 = vpop.f32.mrf.mxu1 }
 0xe04   : > { %v2345_v25 = vpop.xlane.xlu0 %2344 }
 0xe05   : > { %v2346_v26 = vsub.f32 %v2342_v21, %v2345_v25  ;;  %v4986_v21 = vcombine.low %v2502_v15, %v2510_v16  ;;  %v5681_v15 = vld [vmem:[%s6188_s0 + $0xf0] sm:$0xff]  }
 0xe06   : > { %v5682_v16 = vld [vmem:[%s6188_s0 + $0x30] sm:$0xff]  }
 0xe07   : > { %v2347_v27 = vmul.f32 1.442695, %v2346_v26 }
 0xe09   : > { %5816 = vpow2.f32 %v2347_v27  ;;  %v4964_v27 = vld [vmem:[%s6877_s21] ss:$0 sm:$0xff] }
 0xe16   : > { %v5817_v28 = vpop.eup %5816 }
 0xe17   : > { %v2349_v18 = vsel %vm1230_vm5, %v5817_v28, 0.0 }
 0xe18   : > { %2350 = vadd.xlane.f32.xlu1 %v2349_v18  ;;  %v4965_v18 = vld [vmem:[%s6878_s27] ss:$0 sm:$0xff] }
 0xea1   : > { %v2351_v38 = vpop.xlane.xlu1 %2350 }
 0xea2   : > { %5818 = vrcp.f32 %v2351_v38  ;;  %v2512_v38 = vld [vmem:[%s6182_s10 + $0xe0] sm:$0xff] }
 0xeaf   : > { %v5819_v39 = vpop.eup %5818 }
 0xeb0   : > { %v2353_v40 = vmul.f32 %v5819_v39, %v5817_v28  ;;  %v2505_v39 = vld [vmem:[%s6182_s10 + $0xa8] sm:$0xff] }
 0xeb2   : > { %v2354_v41 = vpack.c.bf16 %v2353_v40, %v2353_v40  ;;  %v2513_v40 = vld [vmem:[%s6182_s10 + $0xe8] sm:$0xff] }
 0xeb4   : > { %5556 = vmatmul.mubr.msk.bf16.vlgmr.msra.gmra.mxu0 %vm1230_vm5, %v2354_v41  ;;  %v4970_v41 = vcombine.low %v2486_v30, %v2494_v13  ;;  %v5698_v30 = vld [vmem:[%s6188_s0 + $0x10] sm:$0xff]  }
 0xeb5   : > { %2776 = vmatpush1.bf16.msra.mxu0 %v4982_v1  ;;  %2795 = vmatprep.mubr.bf16.mxu0 %v5925_v20  ;;  %v5699_v13 = vld [vmem:[%s6188_s0 + $0x90] sm:$0xff]  }
 0xeb6   : > { %2777 = vmatprep.subr.bf16.mxu0 %v4967_v8  ;;  %v5676_v8 = vld [vmem:[%s6188_s0 + $0x78] sm:$0xff]  }
 0xeb9   : > { %2778 = vmatpush1.bf16.msra.mxu0 %v4966_v11  ;;  %v5678_v11 = vld [vmem:[%s6188_s0 + $0x38] sm:$0xff]  }
 0xeba   : > { %2857 = vmatprep.subr.bf16.mxu0 %v4987_v17  ;;  %v5684_v17 = vld [vmem:[%s6188_s0 + $0x68] sm:$0xff]  }
 0xf74   : > { %v2396_v42 = vpop.f32.mrf.mxu0 }
 0xf75   : > { %v2402_v43 = vpack.c.bf16 %v2396_v42, %v2396_v42  ;;  %v4972_v42 = vcombine.low %v2487_v31, %v2495_v32  ;;  %v5700_v31 = vld [vmem:[%s6188_s0 + $0x48] sm:$0xff]  }
 0xf76   : > { %v5557_v44 = vpop.f32.mrf.mxu0  ;;  %v5701_v32 = vld [vmem:[%s6188_s0 + $0xc8] sm:$0xff]  }
 0xf77   : > { %5562 = vmatmul.mubr.msk.bf16.vlgmr.msra.gmra.mxu1 %vm1230_vm5, %v2402_v43  ;;  %v4991_v43 = vcombine.high %v2504_v37, %v2512_v38  ;;  %v4993_v44 = vcombine.high %v2505_v39, %v2513_v40 }
 0xf78   : > { %v2399_v45 = vpop.f32.mrf.mxu0  ;;  %2836 = vmatprep.mubr.bf16.mxu1 %v5925_v20 }
 0xf79   : > { %v2488_v45 = vld [vmem:[%s6182_s10 + $0x20] sm:$0xff] }
 0xf7a   : > { %v5558_v46 = vpop.f32.mrf.mxu0 }
 0xf7b   : > { %v2496_v46 = vld [vmem:[%s6182_s10 + $0x60] sm:$0xff] }
0x1037   : > { %v2445_v47 = vpop.f32.mrf.mxu1 }
0x1038   : > { %v2451_v48 = vadd.f32 %v2445_v47, %v6386_v0  ;;  %v2509_v0 = vld [vmem:[%s6182_s10 + $0xc8] sm:$0xff] }
0x1039   : > { %v5563_v49 = vpop.f32.mrf.mxu1  ;;  %v4984_v2 = vcombine.low %v2501_v62, %v2509_v0  ;;  %v4985_v3 = vcombine.high %v2501_v62, %v2509_v0  ;;  %v2489_v47 = vld [vmem:[%s6182_s10 + $0x28] sm:$0xff]  ;;  %v2498_v62 = vld [vmem:[%s6182_s10 + $0x70] sm:$0xff]  ;;  %v2499_v0 = vld [vmem:[%s6182_s10 + $0x78] sm:$0xff] }
0x103a   : > { %v2452_v51 = vadd.f32 %v5824_v50, %v2451_v48  ;;  %v2497_v48 = vld [vmem:[%s6182_s10 + $0x68] sm:$0xff]  ;;  %v4990_v49 = vcombine.low %v2504_v37, %v2512_v38  ;;  %v4992_v50 = vcombine.low %v2505_v39, %v2513_v40  ;;  %v4981_v4 = vcombine.high %v2491_v63, %v2499_v0  ;;  %v5705_v37 = vld [vmem:[%s6188_s0 + $0xc0] sm:$0xff]   ;;  %v5708_v40 = vld [vmem:[%s6188_s0 + $0x178] sm:$0xff]  }
0x103b   : > { %v2448_v52 = vpop.f32.mrf.mxu1  ;;  %2816 = vmatprep.subr.bf16.mxu1 %v4985_v3  ;;  %v4979_v3 = vcombine.high %v2490_v61, %v2498_v62  ;;  %v4978_v5 = vcombine.low %v2490_v61, %v2498_v62  ;;  %v4980_v7 = vcombine.low %v2491_v63, %v2499_v0  ;;  %v5706_v38 = vld [vmem:[%s6188_s0] sm:$0xff]  }
0x103c   : > { %v2455_v53 = vsel %vm1058_vm4, %v2452_v51, 0.0  ;;  %2817 = vmatpush1.bf16.msra.mxu1 %v4984_v2  ;;  %v4977_v52 = vcombine.high %v2489_v47, %v2497_v48  ;;  %v5707_v39 = vld [vmem:[%s6188_s0 + $0x80] sm:$0xff]  }
0x103d   : > { %2456 = vadd.xlane.f32.xlu0 %v2455_v53  ;;  %v5564_v54 = vpop.f32.mrf.mxu1  ;;  %2818 = vmatprep.subr.bf16.mxu1 %v4969_v14  ;;  %v2506_v53 = vld [vmem:[%s6182_s10 + $0xb0] sm:$0xff] }
0x103e   : > { %v2514_v54 = vld [vmem:[%s6182_s10 + $0xf0] sm:$0xff] }
0x103f   : > { %v4994_v1 = vcombine.low %v2506_v53, %v2514_v54  ;;  %v5680_v14 = vld [vmem:[%s6188_s0 + $0x70] sm:$0xff]  }
0x1040   : > { %2819 = vmatpush1.bf16.msra.mxu1 %v4968_v12  ;;  %v5679_v12 = vld [vmem:[%s6188_s0 + $0xb8] sm:$0xff]  }
0x1041   : > { %2898 = vmatprep.subr.bf16.mxu1 %v4989_v10  ;;  %v5689_v10 = vld [vmem:[%s6188_s0 + $0xe0] sm:$0xff]  }
0x10c6   : > { %v2457_v55 = vpop.xlane.xlu0 %2456 }
0x10c7   : > { %v2459_v56 = vmul.f32 0.03125, %v2457_v55  ;;  %v2507_v55 = vld [vmem:[%s6182_s10 + $0xb8] sm:$0xff] }
0x10c9   : > { %v2460_v57 = vsub.f32 %v2452_v51, %v2459_v56  ;;  %v4975_v51 = vcombine.high %v2488_v45, %v2496_v46  ;;  %v2515_v56 = vld [vmem:[%s6182_s10 + $0xf8] sm:$0xff]  ;;  %s6879_s10 = sld [smem:[#allocation21_spill]] }
0x10ca   : > { %v4997_v60 = vcombine.high %v2507_v55, %v2515_v56  ;;  %v4996_v2 = vcombine.low %v2507_v55, %v2515_v56 }
0x10cb   : > { %v2461_v58 = vmul.f32 %v2460_v57, %v2460_v57 }
0x10cd   : > { %v2462_v59 = vsel %vm1058_vm4, %v2461_v58, 0.0  ;;  %v4976_v58 = vcombine.low %v2489_v47, %v2497_v48 }
0x10ce   : > { %2463 = vadd.xlane.f32.xlu1 %v2462_v59  ;;  %v4995_v59 = vcombine.high %v2506_v53, %v2514_v54 }
0x1157   : > { %v2464_v23 = vpop.xlane.xlu1 %2463 }
0x1158   : > { %v2465_v24 = vmul.f32 0.03125, %v2464_v23  ;;  %v5690_v23 = vld [vmem:[%s6188_s0 + $0x20] sm:$0xff]  }
0x115a   : > { %v2466_v25 = vadd.f32 1e-05, %v2465_v24  ;;  %v5691_v24 = vld [vmem:[%s6188_s0 + $0xa0] sm:$0xff]  }
0x115c   : > { %5820 = vrsqrt.f32 %v2466_v25  ;;  %v5692_v25 = vld [vmem:[%s6188_s0 + $0x58] sm:$0xff]  }
0x1169   : > { %v5821_v26 = vpop.eup %5820 }
0x116a   : > { %v2468_v28 = vmul.f32 %v5821_v26, %v2460_v57  ;;  %v4974_v57 = vcombine.low %v2488_v45, %v2496_v46  ;;  %v5693_v26 = vld [vmem:[%s6188_s0 + $0xd8] sm:$0xff]   ;;  %v6524_v45 = vld [vmem:[%s6879_s10 + $0x8] sm:$0xff] }
0x116c   : > { %v2475_v29 = vmul.f32 %v4964_v27, %v2468_v28  ;;  %v5694_v27 = vld [vmem:[%s6188_s0 + $0x18] sm:$0xff]  }
0x116d   : > { %v5695_v28 = vld [vmem:[%s6188_s0 + $0x98] sm:$0xff]  }
0x116e   : > { %v6442_v33 = vadd.f32 %v4965_v18, %v2475_v29  ;;  %v5696_v18 = vld [vmem:[%s6188_s0 + $0x50] sm:$0xff]  }
0x116f   : > { %v5697_v29 = vld [vmem:[%s6188_s0 + $0xd0] sm:$0xff]  }
0x1170   : > { %v6446_v34 = vpack.c.bf16 %v6442_v33, %v6442_v33 }
0x1172   : > { %4998 = vmatmul.mubr.msk.bf16.vlgmr.msra.gmra.mxu0 %vm1058_vm4, %v6446_v34  ;;  %4999 = vmatmul.mubr.msk.bf16.vlgmr.msra.gmra.mxu1 %vm1058_vm4, %v6446_v34 }
0x1173   : > { %2858 = vmatpush1.bf16.msra.mxu0 %v4986_v21  ;;  %2899 = vmatpush1.bf16.msra.mxu1 %v4988_v22  ;;  %v5687_v21 = vld [vmem:[%s6188_s0 + $0xa8] sm:$0xff]   ;;  %v5688_v22 = vld [vmem:[%s6188_s0 + $0x60] sm:$0xff]  }
0x1174   : > { %2859 = vmatprep.subr.bf16.mxu0 %v4971_v35  ;;  %2900 = vmatprep.subr.bf16.mxu1 %v4973_v36  ;;  %v5703_v35 = vld [vmem:[%s6188_s0 + $0x88] sm:$0xff]   ;;  %v5704_v36 = vld [vmem:[%s6188_s0 + $0x40] sm:$0xff]  }
0x1175   : > { %2877 = vmatprep.mubr.bf16.mxu0 %v5925_v20  ;;  %2918 = vmatprep.mubr.bf16.mxu1 %v5925_v20 }
0x1177   : > { %2860 = vmatpush1.bf16.msra.mxu0 %v4970_v41  ;;  %2901 = vmatpush1.bf16.msra.mxu1 %v4972_v42  ;;  %v5709_v41 = vld [vmem:[%s6188_s0 + $0x1f8] sm:$0xff]   ;;  %v2520_v42 = vlaneseq }
0x1178   : > { %2939 = vmatprep.subr.bf16.mxu0 %v4991_v43  ;;  %2980 = vmatprep.subr.bf16.mxu1 %v4993_v44 }
0x1179   : > { %v6520_v43 = vshrl.u32 %v2520_v42, 7 }
0x117a   : > { %5000 = vmatmul.mubr.msk.bf16.vlgmr.msra.gmra.mxu0 %vm1058_vm4, %v6446_v34  ;;  %5001 = vmatmul.mubr.msk.bf16.vlgmr.msra.gmra.mxu1 %vm1058_vm4, %v6446_v34 }
0x117b   : > { %2940 = vmatpush1.bf16.msra.mxu0 %v4990_v49  ;;  %2981 = vmatpush1.bf16.msra.mxu1 %v4992_v50  ;;  %v2546_v44 = vsub.s32 6, %v6520_v43  ;;  %v2522_v47 = vsub.s32 0, %v6520_v43  ;;  %v2530_v48 = vsub.s32 2, %v6520_v43  ;;  %v6534_v49 = vld [vmem:[%s6879_s10] sm:$0xff]  ;;  %v2526_v50 = vsub.s32 1, %v6520_v43 }
0x117c   : > { %2941 = vmatprep.subr.bf16.mxu0 %v4975_v51  ;;  %2982 = vmatprep.subr.bf16.mxu1 %v4977_v52  ;;  %v2534_v51 = vsub.s32 3, %v6520_v43  ;;  %v2542_v0 = vsub.s32 5, %v6520_v43 }
0x117d   : > { %2959 = vmatprep.mubr.bf16.mxu0 %v5925_v20  ;;  %3000 = vmatprep.mubr.bf16.mxu1 %v5925_v20  ;;  %v6529_v46 = vrot.slane %v6524_v45, %v2546_v44  ;;  %v2523_v52 = vrot.slane %v6534_v49, %v2522_v47  ;;  %v2531_v53 = vrot.slane %v6534_v49, %v2530_v48 }
0x117e   : > { %v2527_v54 = vrot.slane %v6534_v49, %v2526_v50  ;;  %v2535_v55 = vrot.slane %v6534_v49, %v2534_v51 }
0x117f   : > { %2942 = vmatpush1.bf16.msra.mxu0 %v4974_v57  ;;  %2983 = vmatpush1.bf16.msra.mxu1 %v4976_v58 }
0x1180   : > { %3021 = vmatprep.subr.bf16.mxu0 %v4995_v59  ;;  %3062 = vmatprep.subr.bf16.mxu1 %v4997_v60 }
0x1182   : > { %5002 = vmatmul.mubr.msk.bf16.vlgmr.msra.gmra.mxu0 %vm1058_vm4, %v6446_v34  ;;  %5003 = vmatmul.mubr.msk.bf16.vlgmr.msra.gmra.mxu1 %vm1058_vm4, %v6446_v34 }
0x1183   : > { %3022 = vmatpush1.bf16.msra.mxu0 %v4994_v1  ;;  %3063 = vmatpush1.bf16.msra.mxu1 %v4996_v2  ;;  %v2550_v1 = vsub.s32 7, %v6520_v43 }
0x1184   : > { %3023 = vmatprep.subr.bf16.mxu0 %v4979_v3  ;;  %3064 = vmatprep.subr.bf16.mxu1 %v4981_v4 }
0x1185   : > { %3041 = vmatprep.mubr.bf16.mxu0 %v5925_v20  ;;  %3082 = vmatprep.mubr.bf16.mxu1 %v5925_v20  ;;  %v5686_v20 = vld [vmem:[%s6188_s0 + $0x28] sm:$0xff]  }
0x1187   : > { %3024 = vmatpush1.bf16.msra.mxu0 %v4978_v5  ;;  %3065 = vmatpush1.bf16.msra.mxu1 %v4980_v7 }
0x1188   : > { %5212 = vmatprep.subr.bf16.mxu0 %v5676_v8  ;;  %5234 = vmatprep.subr.bf16.mxu1 %v5677_v9 }
0x118a   : > { %5004 = vmatmul.mubr.msk.bf16.vlgmr.msra.gmra.mxu0 %vm1058_vm4, %v6446_v34  ;;  %5005 = vmatmul.mubr.msk.bf16.vlgmr.msra.gmra.mxu1 %vm1058_vm4, %v6446_v34  ;;  %v5702_v34 = vld [vmem:[%s6188_s0 + $0x8] sm:$0xff]  }
0x118b   : > { %5213 = vmatpush3.bf16.msra.mxu0 %v5678_v11  ;;  %5235 = vmatpush3.bf16.msra.mxu1 %v5679_v12 }
0x118c   : > { %5214 = vmatprep.subr.bf16.mxu0 %v5680_v14  ;;  %5236 = vmatprep.subr.bf16.mxu1 %v5681_v15  ;;  %v2543_v15 = vrot.slane %v6534_v49, %v2542_v0 }
0x118f   : > { %5215 = vmatpush3.bf16.msra.mxu0 %v5682_v16  ;;  %5237 = vmatpush3.bf16.msra.mxu1 %v5683_v6  ;;  %v2551_v16 = vrot.slane %v6534_v49, %v2550_v1  ;;  %v5710_v6 = vld [vmem:[%s6188_s0 + $0x138] sm:$0xff]  }
0x1190   : > { %5216 = vmatprep.subr.bf16.mxu0 %v5684_v17  ;;  %5238 = vmatprep.subr.bf16.mxu1 %v5685_v19  ;;  %v5711_v17 = vld [vmem:[%s6188_s0 + $0x1b8] sm:$0xff]  }
0x1193   : > { %5217 = vmatpush3.bf16.msra.mxu0 %v5686_v20  ;;  %5239 = vmatpush3.bf16.msra.mxu1 %v5687_v21 }
0x1194   : > { %5218 = vmatprep.subr.bf16.mxu0 %v5688_v22  ;;  %5240 = vmatprep.subr.bf16.mxu1 %v5689_v10  ;;  %v5712_v10 = vld [vmem:[%s6188_s0 + $0x170] sm:$0xff]  }
0x1197   : > { %5219 = vmatpush3.bf16.msra.mxu0 %v5690_v23  ;;  %5241 = vmatpush3.bf16.msra.mxu1 %v5691_v24  ;;  %v5713_v23 = vld [vmem:[%s6188_s0 + $0x1f0] sm:$0xff]  }
0x1198   : > { %5220 = vmatprep.subr.bf16.mxu0 %v5692_v25  ;;  %5242 = vmatprep.subr.bf16.mxu1 %v5693_v26 }
0x119b   : > { %5221 = vmatpush3.bf16.msra.mxu0 %v5694_v27  ;;  %5243 = vmatpush3.bf16.msra.mxu1 %v5695_v28  ;;  %v5714_v28 = vld [vmem:[%s6188_s0 + $0x130] sm:$0xff]  }
0x119c   : > { %5222 = vmatprep.subr.bf16.mxu0 %v5696_v18  ;;  %5244 = vmatprep.subr.bf16.mxu1 %v5697_v29  ;;  %v5715_v18 = vld [vmem:[%s6188_s0 + $0x1b0] sm:$0xff]  }
0x119f   : > { %5223 = vmatpush3.bf16.msra.mxu0 %v5698_v30  ;;  %5245 = vmatpush3.bf16.msra.mxu1 %v5699_v13  ;;  %v5716_v13 = vld [vmem:[%s6188_s0 + $0x168] sm:$0xff]  }
0x11a0   : > { %5224 = vmatprep.subr.bf16.mxu0 %v5700_v31  ;;  %5246 = vmatprep.subr.bf16.mxu1 %v5701_v32  ;;  %v5717_v31 = vld [vmem:[%s6188_s0 + $0x1e8] sm:$0xff]  }
0x11a3   : > { %5225 = vmatpush3.bf16.msra.mxu0 %v5702_v34  ;;  %5247 = vmatpush3.bf16.msra.mxu1 %v5703_v35 }
0x11a4   : > { %5226 = vmatprep.subr.bf16.mxu0 %v5704_v36  ;;  %5248 = vmatprep.subr.bf16.mxu1 %v5705_v37 }
0x11a7   : > { %5227 = vmatpush3.bf16.msra.mxu0 %v5706_v38  ;;  %5249 = vmatpush3.bf16.msra.mxu1 %v5707_v39  ;;  %v5718_v39 = vld [vmem:[%s6188_s0 + $0x128] sm:$0xff]  }
0x11a8   : > { %5256 = vmatprep.subr.bf16.mxu0 %v5708_v40  ;;  %5278 = vmatprep.subr.bf16.mxu1 %v5709_v41  ;;  %v5719_v40 = vld [vmem:[%s6188_s0 + $0x1a8] sm:$0xff]  }
0x1232   : > { %v2797_v56 = vpop.f32.mrf.mxu0  ;;  %v2838_v57 = vpop.f32.mrf.mxu1 }
0x1233   : > { %v2798_v58 = vadd.f32 %v2797_v56, %v2523_v52  ;;  %v2839_v59 = vadd.f32 %v2838_v57, %v2531_v53  ;;  %v5720_v52 = vld [vmem:[%s6188_s0 + $0x160] sm:$0xff]   ;;  %v2538_v56 = vsub.s32 4, %v6520_v43 }
0x1234   : > { %v2799_v60 = vpop.f32.mrf.mxu0  ;;  %v2840_v61 = vpop.f32.mrf.mxu1  ;;  %v5721_v53 = vld [vmem:[%s6188_s0 + $0x1e0] sm:$0xff]  }
0x1235   : > { %v2800_v62 = vadd.f32 %v2799_v60, %v2527_v54  ;;  %v2841_v63 = vadd.f32 %v2840_v61, %v2535_v55  ;;  %v3091_v2 = vmax.f32 %v2798_v58, 0.0  ;;  %v3093_v3 = vmax.f32 %v2839_v59, 0.0  ;;  %v5722_v57 = vld [vmem:[%s6188_s0 + $0x120] sm:$0xff]   ;;  %v5724_v61 = vld [vmem:[%s6188_s0 + $0x158] sm:$0xff]  }
0x1236   : > { %v2801_v4 = vpop.f32.mrf.mxu0  ;;  %v2842_v5 = vpop.f32.mrf.mxu1  ;;  %v5723_v58 = vld [vmem:[%s6188_s0 + $0x1a0] sm:$0xff]  }
0x1237   : > { %v3092_v7 = vmax.f32 %v2800_v62, 0.0  ;;  %v3094_v8 = vmax.f32 %v2841_v63, 0.0  ;;  %v3107_v19 = vpack.c.bf16 %v3091_v2, %v3091_v2  ;;  %v3109_v20 = vpack.c.bf16 %v3093_v3, %v3093_v3  ;;  %v5725_v62 = vld [vmem:[%s6188_s0 + $0x1d8] sm:$0xff]  }
0x1238   : > { %v2802_v9 = vpop.f32.mrf.mxu0  ;;  %v2843_v11 = vpop.f32.mrf.mxu1  ;;  %v2571_v63 = vrot.slane %v6524_v45, %v2538_v56  ;;  %v5726_v4 = vld [vmem:[%s6188_s0 + $0x118] sm:$0xff]  }
0x1239   : > { %v3108_v12 = vpack.c.bf16 %v3092_v7, %v3092_v7  ;;  %v3110_v14 = vpack.c.bf16 %v3094_v8, %v3094_v8  ;;  %v5727_v5 = vld [vmem:[%s6188_s0 + $0x198] sm:$0xff]   ;;  %v5728_v9 = vld [vmem:[%s6188_s0 + $0x150] sm:$0xff]  }
0x123a   : > { %v6560_v21 = vpop.f32.mrf.mxu0  ;;  %v6562_v22 = vpop.f32.mrf.mxu1  ;;  %v5729_v11 = vld [vmem:[%s6188_s0 + $0x1d0] sm:$0xff]  }
0x123b   : > { %4186 = vmatprep.mubr.bf16.mxu0 %v3108_v12  ;;  %4226 = vmatprep.mubr.bf16.mxu1 %v3110_v14 }
0x123c   : > { %v2881_v24 = vpop.f32.mrf.mxu0  ;;  %v2922_v25 = vpop.f32.mrf.mxu1  ;;  %4187 = vmatmul.mubr.bf16.vlgmr.msra.gmra.mxu0 %v3107_v19  ;;  %4227 = vmatmul.mubr.bf16.vlgmr.msra.gmra.mxu1 %v3109_v20  ;;  %v2539_v19 = vrot.slane %v6534_v49, %v2538_v56  ;;  %v2547_v20 = vrot.slane %v6534_v49, %v2546_v44  ;;  %v5734_v44 = vld [vmem:[%s6188_s0 + $0x108] sm:$0xff]  }
0x123d   : > { %v2882_v26 = vadd.f32 %v2881_v24, %v2543_v15  ;;  %v2923_v27 = vadd.f32 %v2922_v25, %v2551_v16  ;;  %5257 = vmatpush3.bf16.msra.mxu0 %v5710_v6  ;;  %5279 = vmatpush3.bf16.msra.mxu1 %v5711_v17  ;;  %v5730_v6 = vld [vmem:[%s6188_s0 + $0x110] sm:$0xff]   ;;  %v5733_v24 = vld [vmem:[%s6188_s0 + $0x1c8] sm:$0xff]   ;;  %v2559_v25 = vrot.slane %v6524_v45, %v2526_v50  ;;  %v5736_v50 = vld [vmem:[%s6188_s0 + $0x140] sm:$0xff]  }
0x123e   : > { %v2883_v29 = vpop.f32.mrf.mxu0  ;;  %v2924_v30 = vpop.f32.mrf.mxu1  ;;  %5258 = vmatprep.subr.bf16.mxu0 %v5712_v10  ;;  %5280 = vmatprep.subr.bf16.mxu1 %v5713_v23  ;;  %v5731_v17 = vld [vmem:[%s6188_s0 + $0x190] sm:$0xff]   ;;  %v5735_v49 = vld [vmem:[%s6188_s0 + $0x188] sm:$0xff]  }
0x123f   : > { %v3096_v32 = vmax.f32 %v2882_v26, 0.0  ;;  %v3098_v34 = vmax.f32 %v2923_v27, 0.0  ;;  %v2567_v26 = vrot.slane %v6524_v45, %v2534_v51  ;;  %v2921_v29 = vadd.f32 %v6562_v22, %v2547_v20  ;;  %v5737_v30 = vld [vmem:[%s6188_s0 + $0x1c0] sm:$0xff]   ;;  %v5741_v22 = vld [vmem:[%s6188_s0 + $0x2f8] sm:$0xff]   ;;  %v5763_v20 = vld [vmem:[%s6188_s0 + $0x290] sm:$0xff]  }
0x1240   : > { %v2884_v35 = vpop.f32.mrf.mxu0  ;;  %v2925_v36 = vpop.f32.mrf.mxu1 }
0x1241   : > { %v3112_v37 = vpack.c.bf16 %v3096_v32, %v3096_v32  ;;  %v3114_v38 = vpack.c.bf16 %v3098_v34, %v3098_v34  ;;  %5259 = vmatpush3.bf16.msra.mxu0 %v5714_v28  ;;  %5281 = vmatpush3.bf16.msra.mxu1 %v5715_v18  ;;  %v2880_v18 = vadd.f32 %v6560_v21, %v2539_v19  ;;  %v5739_v32 = vld [vmem:[%s6188_s0 + $0x180] sm:$0xff]   ;;  %v3097_v35 = vmax.f32 %v2921_v29, 0.0  ;;  %v5740_v21 = vld [vmem:[%s6188_s0 + $0x278] sm:$0xff]  }
0x1242   : > { %v6572_v41 = vpop.f32.mrf.mxu0  ;;  %v6574_v42 = vpop.f32.mrf.mxu1  ;;  %5260 = vmatprep.subr.bf16.mxu0 %v5716_v13  ;;  %5282 = vmatprep.subr.bf16.mxu1 %v5717_v31  ;;  %v5738_v31 = vld [vmem:[%s6188_s0 + $0x100] sm:$0xff]   ;;  %v2555_v19 = vrot.slane %v6524_v45, %v2522_v47  ;;  %v2583_v47 = vrot.slane %v6524_v45, %v2550_v1 }
0x1243   : > { %4266 = vmatprep.mubr.bf16.mxu0 %v3112_v37  ;;  %4306 = vmatprep.mubr.bf16.mxu1 %v3114_v38  ;;  %v3095_v34 = vmax.f32 %v2880_v18, 0.0  ;;  %v5742_v38 = vld [vmem:[%s6188_s0 + $0x238] sm:$0xff]  }
0x1244   : > { %v2963_v54 = vpop.f32.mrf.mxu0  ;;  %v3004_v55 = vpop.f32.mrf.mxu1 }
0x1245   : > { %5261 = vmatpush3.bf16.msra.mxu0 %v5718_v39  ;;  %5283 = vmatpush3.bf16.msra.mxu1 %v5719_v40  ;;  %v2964_v13 = vadd.f32 %v2963_v54, %v2559_v25  ;;  %v3005_v51 = vadd.f32 %v3004_v55, %v2567_v26  ;;  %v3111_v39 = vpack.c.bf16 %v3095_v34, %v3095_v34  ;;  %v5744_v54 = vld [vmem:[%s6188_s0 + $0x270] sm:$0xff]   ;;  %v5766_v25 = vld [vmem:[%s6188_s0 + $0x208] sm:$0xff]  }
0x1246   : > { %v2965_v59 = vpop.f32.mrf.mxu0  ;;  %v3006_v60 = vpop.f32.mrf.mxu1  ;;  %5262 = vmatprep.subr.bf16.mxu0 %v5720_v52  ;;  %5284 = vmatprep.subr.bf16.mxu1 %v5721_v53  ;;  %v3113_v40 = vpack.c.bf16 %v3097_v35, %v3097_v35  ;;  %v5743_v52 = vld [vmem:[%s6188_s0 + $0x2b8] sm:$0xff]   ;;  %v5745_v55 = vld [vmem:[%s6188_s0 + $0x2f0] sm:$0xff]   ;;  %v2962_v26 = vadd.f32 %v6572_v41, %v2555_v19  ;;  %v5771_v41 = vld [vmem:[%s6188_s0 + $0x280] sm:$0xff]  }
0x1247   : > { %v3100_v36 = vmax.f32 %v2964_v13, 0.0  ;;  %v3102_v37 = vmax.f32 %v3005_v51, 0.0  ;;  %v5748_v59 = vld [vmem:[%s6188_s0 + $0x268] sm:$0xff]   ;;  %v5776_v51 = vld [vmem:[%s6188_s0 + $0x370] sm:$0xff]  }
0x1248   : > { %v2966_v2 = vpop.f32.mrf.mxu0  ;;  %v3007_v3 = vpop.f32.mrf.mxu1  ;;  %v5749_v60 = vld [vmem:[%s6188_s0 + $0x2e8] sm:$0xff]   ;;  %v3099_v1 = vmax.f32 %v2962_v26, 0.0  ;;  %v5778_v35 = vld [vmem:[%s6188_s0 + $0x330] sm:$0xff]  }
0x1249   : > { %5263 = vmatpush3.bf16.msra.mxu0 %v5722_v57  ;;  %5285 = vmatpush3.bf16.msra.mxu1 %v5723_v58  ;;  %v3116_v53 = vpack.c.bf16 %v3100_v36, %v3100_v36  ;;  %v3118_v56 = vpack.c.bf16 %v3102_v37, %v3102_v37  ;;  %v5746_v57 = vld [vmem:[%s6188_s0 + $0x230] sm:$0xff]   ;;  %v5753_v2 = vld [vmem:[%s6188_s0 + $0x2e0] sm:$0xff]   ;;  %v5781_v36 = vld [vmem:[%s6188_s0 + $0x3e8] sm:$0xff]  }
0x124a   : > { %v3043_v7 = vpop.f32.mrf.mxu0  ;;  %v3084_v8 = vpop.f32.mrf.mxu1  ;;  %5264 = vmatprep.subr.bf16.mxu0 %v5724_v61  ;;  %5286 = vmatprep.subr.bf16.mxu1 %v5725_v62  ;;  %v5747_v58 = vld [vmem:[%s6188_s0 + $0x2b0] sm:$0xff]   ;;  %v5750_v61 = vld [vmem:[%s6188_s0 + $0x228] sm:$0xff]   ;;  %v5754_v3 = vld [vmem:[%s6188_s0 + $0x220] sm:$0xff]  }
0x124b   : > { %v6588_v12 = vadd.f32 %v3043_v7, %v2571_v63  ;;  %v6591_v14 = vadd.f32 %v3084_v8, %v6529_v46  ;;  %v5732_v46 = vld [vmem:[%s6188_s0 + $0x148] sm:$0xff]   ;;  %v5752_v63 = vld [vmem:[%s6188_s0 + $0x260] sm:$0xff]   ;;  %v5757_v7 = vld [vmem:[%s6188_s0 + $0x2d8] sm:$0xff]  }
0x124c   : > { %v6593_v15 = vpop.f32.mrf.mxu0  ;;  %v6595_v16 = vpop.f32.mrf.mxu1  ;;  %v5751_v62 = vld [vmem:[%s6188_s0 + $0x2a8] sm:$0xff]   ;;  %v5758_v8 = vld [vmem:[%s6188_s0 + $0x218] sm:$0xff]  }
0x124d   : > { %5265 = vmatpush3.bf16.msra.mxu0 %v5726_v4  ;;  %5287 = vmatpush3.bf16.msra.mxu1 %v5727_v5  ;;  %v5755_v4 = vld [vmem:[%s6188_s0 + $0x2a0] sm:$0xff]   ;;  %v5756_v5 = vld [vmem:[%s6188_s0 + $0x258] sm:$0xff]   ;;  %v5782_v37 = vld [vmem:[%s6188_s0 + $0x328] sm:$0xff]  }
0x124e   : > { %v3047_v10 = vpop.f32.mrf.mxu0  ;;  %v3088_v23 = vpop.f32.mrf.mxu1  ;;  %5266 = vmatprep.subr.bf16.mxu0 %v5728_v9  ;;  %5288 = vmatprep.subr.bf16.mxu1 %v5729_v11  ;;  %v5759_v9 = vld [vmem:[%s6188_s0 + $0x298] sm:$0xff]   ;;  %v5760_v11 = vld [vmem:[%s6188_s0 + $0x250] sm:$0xff]  }
0x124f   : > { %v5764_v10 = vld [vmem:[%s6188_s0 + $0x248] sm:$0xff]   ;;  %v2563_v23 = vrot.slane %v6524_v45, %v2530_v48 }
0x1250   : > { %v3048_v27 = vpop.f32.mrf.mxu0  ;;  %v3089_v28 = vpop.f32.mrf.mxu1  ;;  %v5767_v48 = vld [vmem:[%s6188_s0 + $0x288] sm:$0xff]  }
0x1251   : > { %5267 = vmatpush3.bf16.msra.mxu0 %v5730_v6  ;;  %5289 = vmatpush3.bf16.msra.mxu1 %v5731_v17  ;;  %v5761_v6 = vld [vmem:[%s6188_s0 + $0x2d0] sm:$0xff]   ;;  %v5768_v27 = vld [vmem:[%s6188_s0 + $0x240] sm:$0xff]   ;;  %v3003_v28 = vadd.f32 %v6574_v42, %v2563_v23  ;;  %v5773_v42 = vld [vmem:[%s6188_s0 + $0x3f8] sm:$0xff]  }
0x1252   : > { %5268 = vmatprep.subr.bf16.mxu0 %v5732_v46  ;;  %5290 = vmatprep.subr.bf16.mxu1 %v5733_v24  ;;  %v5762_v17 = vld [vmem:[%s6188_s0 + $0x210] sm:$0xff]   ;;  %v5765_v46 = vld [vmem:[%s6188_s0 + $0x2c8] sm:$0xff]   ;;  %v2575_v24 = vrot.slane %v6524_v45, %v2542_v0  ;;  %v3087_v45 = vadd.f32 %v6595_v16, %v2583_v47  ;;  %v5770_v0 = vld [vmem:[%s6188_s0 + $0x200] sm:$0xff]  }
0x1253   : > { %v3101_v18 = vmax.f32 %v3003_v28, 0.0  ;;  %v5775_v16 = vld [vmem:[%s6188_s0 + $0x3b8] sm:$0xff]  }
0x1254   : > { %v3046_v43 = vadd.f32 %v6593_v15, %v2575_v24  ;;  %v5774_v15 = vld [vmem:[%s6188_s0 + $0x338] sm:$0xff]  }
0x1255   : > { %5269 = vmatpush3.bf16.msra.mxu0 %v5734_v44  ;;  %5291 = vmatpush3.bf16.msra.mxu1 %v5735_v49  ;;  %v5769_v44 = vld [vmem:[%s6188_s0 + $0x2c0] sm:$0xff]   ;;  %v5772_v49 = vld [vmem:[%s6188_s0 + $0x378] sm:$0xff]   ;;  %v3117_v13 = vpack.c.bf16 %v3101_v18, %v3101_v18 }
0x1256   : > { %5270 = vmatprep.subr.bf16.mxu0 %v5736_v50  ;;  %5292 = vmatprep.subr.bf16.mxu1 %v5737_v30  ;;  %v3104_v29 = vmax.f32 %v3046_v43, 0.0  ;;  %v3106_v50 = vmax.f32 %v3087_v45, 0.0  ;;  %v3115_v30 = vpack.c.bf16 %v3099_v1, %v3099_v1 }
0x1258   : > { %v3122_v34 = vpack.c.bf16 %v3106_v50, %v3106_v50 }
0x1259   : > { %5271 = vmatpush3.bf16.msra.mxu0 %v5738_v31  ;;  %5293 = vmatpush3.bf16.msra.mxu1 %v5739_v32  ;;  %v3120_v31 = vpack.c.bf16 %v3104_v29, %v3104_v29  ;;  %v5777_v32 = vld [vmem:[%s6188_s0 + $0x3f0] sm:$0xff]  }
0x125a   : > { %5300 = vmatprep.subr.bf16.mxu0 %v5740_v21  ;;  %5322 = vmatprep.subr.bf16.mxu1 %v5741_v22  ;;  %v5779_v21 = vld [vmem:[%s6188_s0 + $0x3b0] sm:$0xff]   ;;  %v5780_v22 = vld [vmem:[%s6188_s0 + $0x368] sm:$0xff]  }
0x125c   : > { %4267 = vmatmul.mubr.bf16.vlgmr.msra.gmra.mxu0 %v3111_v39  ;;  %4307 = vmatmul.mubr.bf16.vlgmr.msra.gmra.mxu1 %v3113_v40  ;;  %v5784_v39 = vld [vmem:[%s6188_s0 + $0x360] sm:$0xff]  }
0x125d   : > { %5301 = vmatpush3.bf16.msra.mxu0 %v5742_v38  ;;  %4346 = vmatprep.mubr.bf16.mxu0 %v3116_v53  ;;  %v5783_v38 = vld [vmem:[%s6188_s0 + $0x3a8] sm:$0xff]   ;;  %v5785_v40 = vld [vmem:[%s6188_s0 + $0x3e0] sm:$0xff]  }
0x125e   : > { %5323 = vmatpush3.bf16.msra.mxu1 %v5743_v52  ;;  %4386 = vmatprep.mubr.bf16.mxu1 %v3118_v56  ;;  %v5786_v52 = vld [vmem:[%s6188_s0 + $0x320] sm:$0xff]   ;;  %v5790_v56 = vld [vmem:[%s6188_s0 + $0x318] sm:$0xff]  }
0x125f   : > { %5302 = vmatprep.subr.bf16.mxu0 %v5744_v54  ;;  %5324 = vmatprep.subr.bf16.mxu1 %v5745_v55  ;;  %v5787_v53 = vld [vmem:[%s6188_s0 + $0x3a0] sm:$0xff]   ;;  %v5788_v54 = vld [vmem:[%s6188_s0 + $0x358] sm:$0xff]  }
0x1260   : > { %v5789_v55 = vld [vmem:[%s6188_s0 + $0x3d8] sm:$0xff]  }
0x1261   : > { %5303 = vmatpush3.bf16.msra.mxu0 %v5746_v57  ;;  %v5791_v57 = vld [vmem:[%s6188_s0 + $0x398] sm:$0xff]  }
0x1262   : > { %5325 = vmatpush3.bf16.msra.mxu1 %v5747_v58  ;;  %5304 = vmatprep.subr.bf16.mxu0 %v5748_v59  ;;  %v5792_v58 = vld [vmem:[%s6188_s0 + $0x350] sm:$0xff]  }
0x1263   : > { %5326 = vmatprep.subr.bf16.mxu1 %v5749_v60  ;;  %v5793_v59 = vld [vmem:[%s6188_s0 + $0x3d0] sm:$0xff]  }
0x1264   : > { %v5794_v60 = vld [vmem:[%s6188_s0 + $0x310] sm:$0xff]  }
0x1265   : > { %5305 = vmatpush3.bf16.msra.mxu0 %v5750_v61  ;;  %v5795_v61 = vld [vmem:[%s6188_s0 + $0x390] sm:$0xff]  }
0x1266   : > { %5327 = vmatpush3.bf16.msra.mxu1 %v5751_v62  ;;  %5306 = vmatprep.subr.bf16.mxu0 %v5752_v63  ;;  %v5796_v62 = vld [vmem:[%s6188_s0 + $0x348] sm:$0xff]  }
0x1267   : > { %5328 = vmatprep.subr.bf16.mxu1 %v5753_v2  ;;  %v5797_v63 = vld [vmem:[%s6188_s0 + $0x3c8] sm:$0xff]  }
0x1268   : > { %v5798_v2 = vld [vmem:[%s6188_s0 + $0x308] sm:$0xff]  }
0x1269   : > { %5307 = vmatpush3.bf16.msra.mxu0 %v5754_v3  ;;  %v5799_v3 = vld [vmem:[%s6188_s0 + $0x388] sm:$0xff]  }
0x126a   : > { %5329 = vmatpush3.bf16.msra.mxu1 %v5755_v4  ;;  %5308 = vmatprep.subr.bf16.mxu0 %v5756_v5  ;;  %v5800_v4 = vld [vmem:[%s6188_s0 + $0x340] sm:$0xff]  }
0x126b   : > { %5330 = vmatprep.subr.bf16.mxu1 %v5757_v7  ;;  %v5801_v5 = vld [vmem:[%s6188_s0 + $0x3c0] sm:$0xff]  }
0x126c   : > { %v5802_v7 = vld [vmem:[%s6188_s0 + $0x300] sm:$0xff]  }
0x126d   : > { %5309 = vmatpush3.bf16.msra.mxu0 %v5758_v8  ;;  %v3103_v8 = vmax.f32 %v6588_v12, 0.0 }
0x126e   : > { %5331 = vmatpush3.bf16.msra.mxu1 %v5759_v9  ;;  %5310 = vmatprep.subr.bf16.mxu0 %v5760_v11  ;;  %v5803_v9 = vld [vmem:[%s6188_s0 + $0x380] sm:$0xff]   ;;  %v3105_v11 = vmax.f32 %v6591_v14, 0.0 }
0x126f   : > { %5332 = vmatprep.subr.bf16.mxu1 %v5761_v6  ;;  %v3119_v6 = vpack.c.bf16 %v3103_v8, %v3103_v8 }
0x1271   : > { %5311 = vmatpush3.bf16.msra.mxu0 %v5762_v17  ;;  %v3121_v17 = vpack.c.bf16 %v3105_v11, %v3105_v11 }
0x1272   : > { %5333 = vmatpush3.bf16.msra.mxu1 %v5763_v20  ;;  %5312 = vmatprep.subr.bf16.mxu0 %v5764_v10  ;;  %v5006_v10 = vld [vmem:[%s955_s2] ss:$0 sm:$0xff] }
0x1273   : > { %5334 = vmatprep.subr.bf16.mxu1 %v5765_v46 }
0x1275   : > { %5313 = vmatpush3.bf16.msra.mxu0 %v5766_v25 }
0x1276   : > { %5335 = vmatpush3.bf16.msra.mxu1 %v5767_v48  ;;  %5314 = vmatprep.subr.bf16.mxu0 %v5768_v27 }
0x1277   : > { %5336 = vmatprep.subr.bf16.mxu1 %v5769_v44 }
0x1279   : > { %5315 = vmatpush3.bf16.msra.mxu0 %v5770_v0 }
0x127a   : > { %5337 = vmatpush3.bf16.msra.mxu1 %v5771_v41  ;;  %5344 = vmatprep.subr.bf16.mxu0 %v5772_v49 }
0x127b   : > { %5366 = vmatprep.subr.bf16.mxu1 %v5773_v42 }
0x127c   : > { %4347 = vmatmul.mubr.bf16.vlgmr.msra.gmra.mxu0 %v3115_v30 }
0x127d   : > { %4387 = vmatmul.mubr.bf16.vlgmr.msra.gmra.mxu1 %v3117_v13  ;;  %5345 = vmatpush3.bf16.msra.mxu0 %v5774_v15 }
0x127e   : > { %4426 = vmatprep.mubr.bf16.mxu0 %v3120_v31  ;;  %5367 = vmatpush3.bf16.msra.mxu1 %v5775_v16 }
0x127f   : > { %4466 = vmatprep.mubr.bf16.mxu1 %v3122_v34  ;;  %5346 = vmatprep.subr.bf16.mxu0 %v5776_v51 }
0x1280   : > { %5368 = vmatprep.subr.bf16.mxu1 %v5777_v32 }
0x1281   : > { %5347 = vmatpush3.bf16.msra.mxu0 %v5778_v35 }
0x1282   : > { %5369 = vmatpush3.bf16.msra.mxu1 %v5779_v21  ;;  %5348 = vmatprep.subr.bf16.mxu0 %v5780_v22 }
0x1283   : > { %5370 = vmatprep.subr.bf16.mxu1 %v5781_v36 }
0x1285   : > { %5349 = vmatpush3.bf16.msra.mxu0 %v5782_v37 }
0x1286   : > { %5371 = vmatpush3.bf16.msra.mxu1 %v5783_v38  ;;  %5350 = vmatprep.subr.bf16.mxu0 %v5784_v39 }
0x1287   : > { %5372 = vmatprep.subr.bf16.mxu1 %v5785_v40 }
0x1289   : > { %5351 = vmatpush3.bf16.msra.mxu0 %v5786_v52 }
0x128a   : > { %5373 = vmatpush3.bf16.msra.mxu1 %v5787_v53  ;;  %5352 = vmatprep.subr.bf16.mxu0 %v5788_v54 }
0x128b   : > { %5374 = vmatprep.subr.bf16.mxu1 %v5789_v55 }
0x128d   : > { %5353 = vmatpush3.bf16.msra.mxu0 %v5790_v56 }
0x128e   : > { %5375 = vmatpush3.bf16.msra.mxu1 %v5791_v57  ;;  %5354 = vmatprep.subr.bf16.mxu0 %v5792_v58 }
0x128f   : > { %5376 = vmatprep.subr.bf16.mxu1 %v5793_v59 }
0x1291   : > { %5355 = vmatpush3.bf16.msra.mxu0 %v5794_v60 }
0x1292   : > { %5377 = vmatpush3.bf16.msra.mxu1 %v5795_v61  ;;  %5356 = vmatprep.subr.bf16.mxu0 %v5796_v62 }
0x1293   : > { %5378 = vmatprep.subr.bf16.mxu1 %v5797_v63 }
0x1295   : > { %5357 = vmatpush3.bf16.msra.mxu0 %v5798_v2 }
0x1296   : > { %5379 = vmatpush3.bf16.msra.mxu1 %v5799_v3  ;;  %5358 = vmatprep.subr.bf16.mxu0 %v5800_v4 }
0x1297   : > { %5380 = vmatprep.subr.bf16.mxu1 %v5801_v5 }
0x1299   : > { %5359 = vmatpush3.bf16.msra.mxu0 %v5802_v7 }
0x129a   : > { %5381 = vmatpush3.bf16.msra.mxu1 %v5803_v9 }
0x129c   : > { %4427 = vmatmul.mubr.bf16.vlgmr.msra.gmra.mxu0 %v3119_v6  ;;  %v5136_v6 = vld [vmem:[%s961_s29] ss:$0 sm:$0xff] }
0x129d   : > { %4467 = vmatmul.mubr.bf16.vlgmr.msra.gmra.mxu1 %v3121_v17 }
0x12fc   : > { %v5228_v19 = vpop.f32.mrf.mxu0  ;;  %v5250_v20 = vpop.f32.mrf.mxu1 }
0x12fe   : > { %v5229_v12 = vpop.f32.mrf.mxu0  ;;  %v5251_v23 = vpop.f32.mrf.mxu1 }
0x12ff   : > { %v5230_v46 = vadd.f32 %v5229_v12, %v5228_v19  ;;  %v5252_v24 = vadd.f32 %v5251_v23, %v5250_v20 }
0x1300   : > { %v5231_v47 = vpop.f32.mrf.mxu0  ;;  %v5253_v14 = vpop.f32.mrf.mxu1 }
0x1301   : > { %v4189_v25 = vadd.f32 %v5230_v46, %v5006_v10 }
0x1302   : > { %v5232_v26 = vpop.f32.mrf.mxu0  ;;  %v5254_v48 = vpop.f32.mrf.mxu1 }
0x1303   : > { %v4229_v27 = vadd.f32 %v5252_v24, %v4189_v25 }
0x131c   : > { %v5272_v28 = vpop.f32.mrf.mxu0  ;;  %v5294_v44 = vpop.f32.mrf.mxu1 }
0x131e   : > { %v5273_v43 = vpop.f32.mrf.mxu0  ;;  %v5295_v45 = vpop.f32.mrf.mxu1 }
0x131f   : > { %v5274_v51 = vadd.f32 %v5273_v43, %v5272_v28  ;;  %v5296_v32 = vadd.f32 %v5295_v45, %v5294_v44 }
0x1320   : > { %v5275_v0 = vpop.f32.mrf.mxu0  ;;  %v5297_v1 = vpop.f32.mrf.mxu1 }
0x1321   : > { %v4269_v31 = vadd.f32 %v5274_v51, %v4229_v27 }
0x1322   : > { %v5276_v41 = vpop.f32.mrf.mxu0  ;;  %v5298_v49 = vpop.f32.mrf.mxu1 }
0x1323   : > { %v4309_v35 = vadd.f32 %v5296_v32, %v4269_v31 }
0x133c   : > { %v5316_v18 = vpop.f32.mrf.mxu0 }
0x133d   : > { %v5338_v42 = vpop.f32.mrf.mxu1 }
0x133e   : > { %v5317_v29 = vpop.f32.mrf.mxu0 }
0x133f   : > { %v5339_v50 = vpop.f32.mrf.mxu1  ;;  %v5318_v34 = vadd.f32 %v5317_v29, %v5316_v18 }
0x1340   : > { %v5319_v15 = vpop.f32.mrf.mxu0  ;;  %v5340_v36 = vadd.f32 %v5339_v50, %v5338_v42 }
0x1341   : > { %v5341_v30 = vpop.f32.mrf.mxu1  ;;  %v4349_v21 = vadd.f32 %v5318_v34, %v4309_v35 }
0x1342   : > { %v5320_v16 = vpop.f32.mrf.mxu0 }
0x1343   : > { %v5342_v13 = vpop.f32.mrf.mxu1  ;;  %v4389_v39 = vadd.f32 %v5340_v36, %v4349_v21 }
0x135c   : > { %v5360_v22 = vpop.f32.mrf.mxu0 }
0x135d   : > { %v5382_v37 = vpop.f32.mrf.mxu1 }
0x135e   : > { %v5361_v38 = vpop.f32.mrf.mxu0 }
0x135f   : > { %v5362_v40 = vadd.f32 %v5361_v38, %v5360_v22  ;;  %v5383_v52 = vpop.f32.mrf.mxu1 }
0x1360   : > { %v5363_v53 = vpop.f32.mrf.mxu0  ;;  %v5384_v55 = vadd.f32 %v5383_v52, %v5382_v37 }
0x1361   : > { %v4429_v54 = vadd.f32 %v5362_v40, %v4389_v39  ;;  %v5385_v56 = vpop.f32.mrf.mxu1 }
0x1362   : > { %v5364_v57 = vpop.f32.mrf.mxu0 }
0x1363   : > { %v4469_v58 = vadd.f32 %v5384_v55, %v4429_v54  ;;  %v5386_v59 = vpop.f32.mrf.mxu1 }
0x1365   : > { %v4474_v60 = vadd.f32 %v4469_v58, %v6442_v33  ;;  %v5135_v33 = vld [vmem:[%s958_s18] ss:$0 sm:$0xff] }
0x1367   : > { %v4477_v61 = vsel %vm1058_vm4, %v4474_v60, 0.0 }
0x1368   : > { %4478 = vadd.xlane.f32.xlu0 %v4477_v61 }
0x13f1   : > { %v4479_v62 = vpop.xlane.xlu0 %4478 }
0x13f2   : > { %v4480_v63 = vmul.f32 0.03125, %v4479_v62 }
0x13f4   : > { %v4481_v2 = vsub.f32 %v4474_v60, %v4480_v63 }
0x13f6   : > { %v4482_v3 = vmul.f32 %v4481_v2, %v4481_v2 }
0x13f8   : > { %v4483_v4 = vsel %vm1058_vm4, %v4482_v3, 0.0 }
0x13f9   : > { %4484 = vadd.xlane.f32.xlu1 %v4483_v4 }
0x1482   : > { %v4485_v5 = vpop.xlane.xlu1 %4484 }
0x1483   : > { %v4486_v7 = vmul.f32 0.03125, %v4485_v5 }
0x1485   : > { %v4487_v8 = vadd.f32 1e-05, %v4486_v7 }
0x1487   : > { %5822 = vrsqrt.f32 %v4487_v8 }
0x1494   : > { %v5823_v9 = vpop.eup %5822 }
0x1495   : > { %v4489_v11 = vmul.f32 %v5823_v9, %v4481_v2 }
0x1497   : > { %v4496_v17 = vmul.f32 %v5135_v33, %v4489_v11  ;;  %4508 = sbr.rel (%p5137_p1) target bundleno = 5484 (0x156c), region = 116 }
0x1499   : > { %v4503_v19 = vadd.f32 %v5136_v6, %v4496_v17 }
0x149b   : > { %4504 = vst.msk [vmem:[#allocation2] sm:$0xff] %vm1058_vm4, %v4503_v19 }
0x149c   : > { %v5825_v20 = vld [vmem:[%s6883_s26 + $0x8] sm:$0xff]   ;;  %v4509_v10 = vpack.c.bf16 %v4503_v19, %v4503_v19  ;;  %v5926_v12 = vmov 0.0   ;;  %v5826_v23 = vld [vmem:[%s6883_s26] sm:$0xff]   ;;  %vm5927_vm7 = vmmov 0   ;;  %vm4574_vm8 = vcmask 57344  }
0x149d   : > { %5565 = vmatprep.subr.bf16.mxu0 %v5926_v12  ;;  %5569 = vmatprep.mubr.msk.bf16.mxu0 %vm5927_vm7, %v5926_v12  ;;  %v4514_v47 = vld [vmem:[%s6884_s7] sm:$0x1] }
0x149e   : > { %5566 = vmatpush3.bf16.msra.mxu0 %v5825_v20  ;;  %v4516_v46 = vshrl.u32 %v4509_v10, 16 }
0x149f   : > { %5567 = vmatprep.subr.bf16.mxu0 %v5926_v12 }
0x14a0   : > { %v4518_v24 = vrot.slane %v4516_v46, 3 }
0x14a2   : > { %5568 = vmatpush3.bf16.msra.mxu0 %v5826_v23 }
0x14a5   : > { %5570 = vmatmul.mubr.msk.bf16.vlgmr.msra.gmra.mxu0 %vm1058_vm4, %v4518_v24 }
0x1565   : > { %v4568_v14 = vpop.f32.mrf.mxu0 }
0x1566   : > { %v4569_v25 = vadd.f32 %v4568_v14, %v4514_v47 }
0x1567   : > { %v5571_v26 = vpop.f32.mrf.mxu0 }
0x1568   : > { %4575 = vst.msk [vmem:[%s6204_s30] sm:$0x1] %vm4574_vm8, %v4569_v25 }
0x1569   : > { %v4571_v48 = vpop.f32.mrf.mxu0 }
0x156b   : > { %v5572_v27 = vpop.f32.mrf.mxu0 }
0x156c PF: > { %s6885_s20 = sld [smem:[#allocation9_spill]]  ;;  %s4589_s15 = sshll.u32 %s6204_s30, 4  ;;  %s4590_s15 = int_to_ptr.vmem [resolvable:$true] %s4589_s15 }
0x156d   : > { %s6887_s27 = sld [smem:[#allocation39_spill]]  ;;  %s6888_s19 = sand.u32 1, %s5895_s28  }
0x156e   : > { %s4577_s0 = scalar_lea.sflag [#allocation4], %s6888_s19  ;;  %s5827_s2 = scalar_lea.vmem %s4590_s15, 16 }
0x156f   : > { %p5828_p2 = scmp.ne.s32.totalorder %s4590_s15, %s5827_s2  ;;  %s5928_s24 = smov [#allocation3]  }
0x1570   : > { %s5831_s14 = sshll.u32 %s5928_s24, 4  ;;  %s5832_s14 = int_to_ptr.vmem [resolvable:$false] %s5831_s14 }
0x1571   : > { %p5829_p4 = pnand %p5828_p2, %p6093_p3  ;;  %s5833_s4 = scalar_lea.vmem %s5832_s14, 32 }
0x1572   : > { %s5141_s21 = sshll.u32 %s6885_s20, 4  ;;  %p5834_p6 = scmp.lt.s32.totalorder %s4590_s15, %s5832_s14 }
0x1573   : > { %s4587_s10 = scalar_lea.hbm %s6887_s27, %s5141_s21  ;;  %p5830_p5 = pneg %p5829_p4 }
0x1574   : > { %p5835_p7 = scmp.lt.s32.totalorder %s5833_s4, %s5827_s2 }
0x1576   : > { %p5836_p8 = por %p5835_p7, %p5834_p6 }
0x1578   : > { %p5837_p10 = pnand %p5836_p8, %p5830_p5 }
0x157a   : > { %5840 = shalt.err (!%p5837_p10)
}
0x157b   : > { %s5841_s1 = scalar_lea.hbm %s4587_s10, 16  ;;  %s5845_s8 = scalar_lea.hbm %s6887_s27, 32 }
0x157c   : > { %p5842_p11 = scmp.ne.s32.totalorder %s4587_s10, %s5841_s1  ;;  %p5846_p0 = scmp.lt.s32.totalorder %s4587_s10, %s6887_s27 }
0x157d   : > { %p5847_p1 = scmp.lt.s32.totalorder %s5845_s8, %s5841_s1 }
0x157e   : > { %p5843_p12 = pnand %p5842_p11, %p6093_p3 }
0x157f   : > { %p5848_p2 = por %p5847_p1, %p5846_p0 }
0x1580   : > { %p5844_p13 = pneg %p5843_p12 }
0x1582   : > { %p5849_p4 = pnand %p5848_p2, %p5844_p13 }
0x1584   : > { %5852 = shalt.err (!%p5849_p4)
}
0x1585   : > { %5573 = dma.vmem_to_hbm [thread:$0]  (%p6093_p3), %s4590_s15, 16, %s4587_s10, %s4577_s0  }
0x1586 PF: > { %s6889_s23 = sld [smem:[#allocation12_spill]] }
0x1587   : > { %s6890_s3 = sld [smem:[#allocation6_spill]] }
0x158c   : > { %p5579_p5 = scmp.ge.s32.totalorder %s6889_s23, 2 }
0x158d   : > { %s4601_s7 = sand.u32 1, %s6890_s3  }
0x158e   : > { %p5576_p6 = pnand %p5579_p5, %p6103_p9  ;;  %s4602_s20 = scalar_lea.sflag [#allocation4], %s4601_s7 }
0x1590   : > { %p5577_p7 = pneg %p5576_p6 }
0x1592   : > { %5886 = dma.done.wait (%p5577_p7), %s4602_s20, 16  }
0x1593   : > { %5888 = vsyncadd (%p5577_p7), %s4602_s20, 4294967280  ;;  %s35_s1 = sadd.s32 1, %s6889_s23   ;;  %s6892_s21 = sld [smem:[#allocation7_spill]] }
0x1594   : > { %p32_p8 = scmp.ge.s32.totalorder %s35_s1, 6   ;;  %s6893_s29 = sld [smem:[#allocation17_spill]] }
0x1595   : > { %s6894_s30 = sld [smem:[#allocation10_spill]]  ;;  %s6898_s3 = smov %s5895_s28 }
0x1596   : > { %s6895_s4 = sld [smem:[#allocation11_spill]]  ;;  %34 = sbr.rel (!%p32_p8) target bundleno = 24 (0x18), region = 220 }
0x1597   : > { %s6896_s0 = sld [smem:[#allocation13_spill]] }
0x1598   : > { %s6897_s23 = sld [smem:[#allocation15_spill]] }
0x1599   : > { %s6899_s28 = smov %s6892_s21 }
0x159b   :  { %4606 = vsyncpa [#allocation4], 1 }
0x159c   :  { %4608 = vsyncpa [#allocation4 + $0x1], 1 }

</bundles_post_ra>
